<compile_context>
chip_gen: v7x
topology: tpu7x:2x2x1
jax: 0.10.0
libtpu: 0.0.40
codegen_flags: <defaults>
</compile_context>

<pallas_src>
import functools
import math

import jax
import jax.numpy as jnp
from jax import lax
from jax.experimental import pallas as pl
from jax.experimental.pallas import tpu as pltpu  # noqa: F401  (TPU-specific tuning hooks)

F_CONST = 1.3875          # fixed focal multiplier from intr_param2mtx
LN4 = math.log(4.0)


def _fused_kernel(feat_ref, w_ref, b_ref,
                  normal_ref, offset_ref, gtn_t_ref, center_ref,
                  snorm_ref, points_t_ref,
                  intr_ref, ndist_ref, cdist_ref, refl_ref, rpts_ref,
                  *, img_h, img_w):
    f32 = jnp.float32

    # ------------------------------------------------------------------ #
    # 1) intrinsics head tail: pool + Linear(768,3) + intr_param2mtx      #
    # ------------------------------------------------------------------ #
    # AdaptiveAvgPool2d((1,1)) == mean over the HW (sublane) axis.
    pooled = jnp.mean(feat_ref[...], axis=1, keepdims=True)           # (B,1,C)
    w = w_ref[...]                                                     # (3,C) torch layout
    b = b_ref[...]                                                     # (1,3)

    # Single broadcasted multiply + single lane reduction for all 3 channels.
    prods = pooled * w[None, :, :]                                     # (B,3,C)
    params = jnp.sum(prods, axis=-1, keepdims=True) + b[:, :, None]    # (B,3,1)
    t = jnp.tanh(params)                                               # (B,3,1)
    t0 = t[:, 0:1, :]
    t1 = t[:, 1:2, :]
    t2 = t[:, 2:3, :]

    scale_f = jnp.exp(t0 * LN4)                 # 4 ** tanh(p0)         (B,1,1)
    fx = F_CONST * img_w * scale_f              # intr[0,0]
    fy = F_CONST * img_h * scale_f              # intr[1,1]
    cx = img_w * 0.5 + t1 * (img_w * 0.5)       # intr[0,2]
    cy = img_h * 0.5 + t2 * (img_h * 0.5)       # intr[1,2]

    ridx = lax.broadcasted_iota(jnp.int32, intr_ref.shape, 1)
    cidx = lax.broadcasted_iota(jnp.int32, intr_ref.shape, 2)

    def cell(i, j):
        return ((ridx == i) & (cidx == j)).astype(f32)

    intr_ref[...] = (cell(0, 0) * fx + cell(1, 1) * fy +
                     cell(0, 2) * cx + cell(1, 2) * cy + cell(2, 2))

    # ------------------------------------------------------------------ #
    # 2) prepare_symm_output (unrolled K=3 VPU FMAs)                      #
    # ------------------------------------------------------------------ #
    n = normal_ref[...]                                                # (B,P,3)
    g = gtn_t_ref[...]                                                 # (B,3,G)
    c = center_ref[...]                                                # (B,1,3)

    def nk(k):
        return n[:, :, k:k + 1]                                        # (B,P,1)

    def gk(k):
        return g[:, k:k + 1, :]                                        # (B,1,G)

    def ck(k):
        return c[:, :, k:k + 1]                                        # (B,1,1)

    # normal_dist = 1 - normal @ gt_normal^T
    ndist_ref[...] = 1.0 - (nk(0) * gk(0) + nk(1) * gk(1) + nk(2) * gk(2))

    # center_dist = (normal . center + offset)^2
    cd = nk(0) * ck(0) + nk(1) * ck(1) + nk(2) * ck(2) + offset_ref[...]   # (B,P,1)
    cdist_ref[...] = cd * cd

    # ------------------------------------------------------------------ #
    # 3) reflection matrix (I - 2 n n^T) + reflect_query_points           #
    # ------------------------------------------------------------------ #
    # NOTE: R is a valid reflection only if symm_normal_used is unit-norm
    # (same implicit assumption as the PyTorch module).
    s = snorm_ref[...]                                                 # (B,1,3)

    def sn(j):
        return s[:, :, j:j + 1]                                        # (B,1,1)

    # 9 per-batch scalar coefficients, reused for the matrix and the points.
    R = [[(1.0 if i == j else 0.0) - 2.0 * sn(i) * sn(j) for j in range(3)]
         for i in range(3)]

    r_ridx = lax.broadcasted_iota(jnp.int32, refl_ref.shape, 1)
    r_cidx = lax.broadcasted_iota(jnp.int32, refl_ref.shape, 2)
    refl = jnp.zeros(refl_ref.shape, f32)
    for i in range(3):
        for j in range(3):
            refl = refl + ((r_ridx == i) & (r_cidx == j)).astype(f32) * R[i][j]
    refl_ref[...] = refl

    # reflected = R @ (p - c) + c, lane-dense on [B, 3, N]  (== bmm(R, p^T)^T)
    pts = points_t_ref[...]                                            # (B,3,N)
    pc = [pts[:, j:j + 1, :] - ck(j) for j in range(3)]                # (B,1,N)
    rows = []
    for i in range(3):
        rows.append(ck(i) + R[i][0] * pc[0] + R[i][1] * pc[1] + R[i][2] * pc[2])
    rpts_ref[...] = jnp.concatenate(rows, axis=1)                      # single full store


def graph_heads_fused(intr_feat, w_proj, b_proj,
                      normal_norm, plane_offset, gt_normal, center_coords,
                      symm_normal_used, points, *, img_h, img_w):
    """Fused forward of the intrinsics head tail + symm output + reflection path.

    intr_feat:        [B, HW, C]  (channels-last feature map)
    w_proj:           [3, C]      (torch Linear layout)
    b_proj:           [1, 3]
    normal_norm:      [B, P, 3]
    plane_offset:     [B, P, 1]
    gt_normal:        [B, G, 3]
    center_coords:    [B, 1, 3]
    symm_normal_used: [B, 1, 3]
    points:           [B, N, 3]
    """
    B, HW, C = intr_feat.shape
    P = normal_norm.shape[1]
    G = gt_normal.shape[1]
    N = points.shape[1]

    # Layout plumbing only: lane-dense [B,3,*] views for the kernel.
    gtn_t = jnp.transpose(gt_normal, (0, 2, 1))        # (B, 3, G)
    points_t = jnp.transpose(points, (0, 2, 1))        # (B, 3, N)  N on the lane axis

    kernel = functools.partial(_fused_kernel, img_h=float(img_h), img_w=float(img_w))
    intr, ndist, cdist, refl, rpts_t = pl.pallas_call(
        kernel,
        out_shape=(
            jax.ShapeDtypeStruct((B, 3, 3), jnp.float32),   # intrinsics
            jax.ShapeDtypeStruct((B, P, G), jnp.float32),   # normal_dist
            jax.ShapeDtypeStruct((B, P, 1), jnp.float32),   # center_dist (pre-squeeze)
            jax.ShapeDtypeStruct((B, 3, 3), jnp.float32),   # reflection matrices
            jax.ShapeDtypeStruct((B, 3, N), jnp.float32),   # reflected points (lane-dense)
        ),
        # No grid / default whole-array VMEM blocks: every operand is tiny
        # (<400 KiB total), so a single un-tiled invocation is optimal.
    )(intr_feat, w_proj, b_proj, normal_norm, plane_offset,
      gtn_t, center_coords, symm_normal_used, points_t)

    reflected_points = jnp.transpose(rpts_t, (0, 2, 1))    # back to [B, N, 3]
    return intr, ndist, cdist[..., 0], refl, reflected_points


if __name__ == "__main__":
    key = jax.random.PRNGKey(0)
    B = 2
    C = 768            # self.intr_feat_channels
    Hf = Wf = 8        # spatial size of the (simulated) DPT intr feature map
    IMG_H = IMG_W = 64 # opt.H, opt.W
    P = 8              # number of symmetry-plane proposals
    G = 4              # number of GT symmetry planes
    N = 128            # number of query points

    k1, k2, k3, k4, k5, k6, k7 = jax.random.split(key, 7)

    # Simulated intr feature map (stand-in for dpt_depth/intr_head output).
    intr_feat = jax.random.normal(k1, (B, Hf * Wf, C), dtype=jnp.float32)

    # intr_proj: nn.Linear(768, 3) with zero-initialized weight & bias (per __init__),
    # kept in torch layout (out_features, in_features) = (3, 768).
    w_proj = jnp.zeros((3, C), dtype=jnp.float32)
    b_proj = jnp.zeros((1, 3), dtype=jnp.float32)

    def _unit(x):
        return x / jnp.linalg.norm(x, axis=-1, keepdims=True)

    # Simulated SymmDecoder outputs / GT targets.
    normal_norm = _unit(jax.random.normal(k2, (B, P, 3), dtype=jnp.float32))
    plane_offset = 0.1 * jax.random.normal(k3, (B, P, 1), dtype=jnp.float32)
    gt_normal = _unit(jax.random.normal(k4, (B, G, 3), dtype=jnp.float32))
    center_coords = 0.5 * jax.random.normal(k5, (B, 1, 3), dtype=jnp.float32)
    symm_normal_used = _unit(jax.random.normal(k6, (B, 1, 3), dtype=jnp.float32))
    gt_points_cam = jax.random.normal(k7, (B, N, 3), dtype=jnp.float32)

    fused = jax.jit(graph_heads_fused, static_argnames=("img_h", "img_w"))
    (intr_pred, normal_dist, center_dist,
     refl_mx, reflected_points) = fused(
        intr_feat, w_proj, b_proj,
        normal_norm, plane_offset, gt_normal, center_coords,
        symm_normal_used, gt_points_cam,
        img_h=IMG_H, img_w=IMG_W)

    for out in (intr_pred, normal_dist, center_dist, refl_mx, reflected_points):
        jax.block_until_ready(out)
    print("KERNEL_OK")
</pallas_src>

<mosaic_0001>
module attributes {stable_mosaic.version = 11 : i64} {
  func.func @_fused_kernel(%arg0: memref<2x64x768xf32, #tpu.memory_space<vmem>>, %arg1: memref<3x768xf32, #tpu.memory_space<vmem>>, %arg2: memref<1x3xf32, #tpu.memory_space<vmem>>, %arg3: memref<2x8x3xf32, #tpu.memory_space<vmem>>, %arg4: memref<2x8x1xf32, #tpu.memory_space<vmem>>, %arg5: memref<2x3x4xf32, #tpu.memory_space<vmem>>, %arg6: memref<2x1x3xf32, #tpu.memory_space<vmem>>, %arg7: memref<2x1x3xf32, #tpu.memory_space<vmem>>, %arg8: memref<2x3x128xf32, #tpu.memory_space<vmem>>, %arg9: memref<2x3x3xf32, #tpu.memory_space<vmem>>, %arg10: memref<2x8x4xf32, #tpu.memory_space<vmem>>, %arg11: memref<2x8x1xf32, #tpu.memory_space<vmem>>, %arg12: memref<2x3x3xf32, #tpu.memory_space<vmem>>, %arg13: memref<2x3x128xf32, #tpu.memory_space<vmem>>) attributes {dimension_semantics = [], scalar_prefetch = 0 : i64, scratch_operands = 0 : i64, tpu.core_type = #tpu.core_type<tc>} {
    %c0 = arith.constant 0 : index
    %c0_0 = arith.constant 0 : index
    %c0_1 = arith.constant 0 : index
    %0 = vector.load %arg0[%c0, %c0_0, %c0_1] : memref<2x64x768xf32, #tpu.memory_space<vmem>>, vector<2x64x768xf32>
    %cst = arith.constant dense<0.000000e+00> : vector<2x768xf32>
    %1 = vector.multi_reduction <add>, %0, %cst [1] : vector<2x64x768xf32> to vector<2x768xf32>
    %2 = vector.shape_cast %1 : vector<2x768xf32> to vector<2x1x768xf32>
    %cst_2 = arith.constant 6.400000e+01 : f32
    %3 = vector.broadcast %cst_2 : f32 to vector<2x1x768xf32>
    %4 = arith.divf %2, %3 : vector<2x1x768xf32>
    %c0_3 = arith.constant 0 : index
    %c0_4 = arith.constant 0 : index
    %5 = vector.load %arg1[%c0_3, %c0_4] : memref<3x768xf32, #tpu.memory_space<vmem>>, vector<3x768xf32>
    %c0_5 = arith.constant 0 : index
    %c0_6 = arith.constant 0 : index
    %6 = vector.load %arg2[%c0_5, %c0_6] : memref<1x3xf32, #tpu.memory_space<vmem>>, vector<1x3xf32>
    %7 = vector.shape_cast %5 : vector<3x768xf32> to vector<1x3x768xf32>
    %8 = vector.broadcast %4 : vector<2x1x768xf32> to vector<2x3x768xf32>
    %9 = vector.broadcast %7 : vector<1x3x768xf32> to vector<2x3x768xf32>
    %10 = arith.mulf %8, %9 : vector<2x3x768xf32>
    %cst_7 = arith.constant dense<0.000000e+00> : vector<2x3xf32>
    %11 = vector.multi_reduction <add>, %10, %cst_7 [2] : vector<2x3x768xf32> to vector<2x3xf32>
    %12 = vector.shape_cast %11 : vector<2x3xf32> to vector<2x3x1xf32>
    %13 = vector.shape_cast %6 : vector<1x3xf32> to vector<1x3x1xf32>
    %14 = vector.broadcast %13 : vector<1x3x1xf32> to vector<2x3x1xf32>
    %15 = arith.addf %12, %14 : vector<2x3x1xf32>
    %16 = math.tanh %15 : vector<2x3x1xf32>
    %17 = vector.extract_strided_slice %16 {offsets = [0, 0, 0], sizes = [2, 1, 1], strides = [1, 1, 1]} : vector<2x3x1xf32> to vector<2x1x1xf32>
    %18 = vector.extract_strided_slice %16 {offsets = [0, 1, 0], sizes = [2, 1, 1], strides = [1, 1, 1]} : vector<2x3x1xf32> to vector<2x1x1xf32>
    %19 = vector.extract_strided_slice %16 {offsets = [0, 2, 0], sizes = [2, 1, 1], strides = [1, 1, 1]} : vector<2x3x1xf32> to vector<2x1x1xf32>
    %cst_8 = arith.constant 1.38629436 : f32
    %20 = vector.broadcast %cst_8 : f32 to vector<2x1x1xf32>
    %21 = arith.mulf %17, %20 : vector<2x1x1xf32>
    %22 = math.exp %21 : vector<2x1x1xf32>
    %cst_9 = arith.constant 8.880000e+01 : f32
    %23 = vector.broadcast %cst_9 : f32 to vector<2x1x1xf32>
    %24 = arith.mulf %23, %22 : vector<2x1x1xf32>
    %cst_10 = arith.constant 8.880000e+01 : f32
    %25 = vector.broadcast %cst_10 : f32 to vector<2x1x1xf32>
    %26 = arith.mulf %25, %22 : vector<2x1x1xf32>
    %cst_11 = arith.constant 3.200000e+01 : f32
    %27 = vector.broadcast %cst_11 : f32 to vector<2x1x1xf32>
    %28 = arith.mulf %18, %27 : vector<2x1x1xf32>
    %cst_12 = arith.constant 3.200000e+01 : f32
    %29 = vector.broadcast %cst_12 : f32 to vector<2x1x1xf32>
    %30 = arith.addf %29, %28 : vector<2x1x1xf32>
    %cst_13 = arith.constant 3.200000e+01 : f32
    %31 = vector.broadcast %cst_13 : f32 to vector<2x1x1xf32>
    %32 = arith.mulf %19, %31 : vector<2x1x1xf32>
    %cst_14 = arith.constant 3.200000e+01 : f32
    %33 = vector.broadcast %cst_14 : f32 to vector<2x1x1xf32>
    %34 = arith.addf %33, %32 : vector<2x1x1xf32>
    %35 = tpu.iota {dimensions = array<i32: 1>} : vector<2x3x3xi32>
    %36 = tpu.iota {dimensions = array<i32: 2>} : vector<2x3x3xi32>
    %c0_i32 = arith.constant 0 : i32
    %37 = vector.broadcast %c0_i32 : i32 to vector<2x3x3xi32>
    %38 = arith.cmpi eq, %35, %37 : vector<2x3x3xi32>
    %c0_i32_15 = arith.constant 0 : i32
    %39 = vector.broadcast %c0_i32_15 : i32 to vector<2x3x3xi32>
    %40 = arith.cmpi eq, %36, %39 : vector<2x3x3xi32>
    %41 = arith.andi %38, %40 : vector<2x3x3xi1>
    %42 = arith.extui %41 : vector<2x3x3xi1> to vector<2x3x3xi32>
    %43 = arith.sitofp %42 : vector<2x3x3xi32> to vector<2x3x3xf32>
    %44 = vector.broadcast %24 : vector<2x1x1xf32> to vector<2x3x3xf32>
    %45 = arith.mulf %43, %44 : vector<2x3x3xf32>
    %c1_i32 = arith.constant 1 : i32
    %46 = vector.broadcast %c1_i32 : i32 to vector<2x3x3xi32>
    %47 = arith.cmpi eq, %35, %46 : vector<2x3x3xi32>
    %c1_i32_16 = arith.constant 1 : i32
    %48 = vector.broadcast %c1_i32_16 : i32 to vector<2x3x3xi32>
    %49 = arith.cmpi eq, %36, %48 : vector<2x3x3xi32>
    %50 = arith.andi %47, %49 : vector<2x3x3xi1>
    %51 = arith.extui %50 : vector<2x3x3xi1> to vector<2x3x3xi32>
    %52 = arith.sitofp %51 : vector<2x3x3xi32> to vector<2x3x3xf32>
    %53 = vector.broadcast %26 : vector<2x1x1xf32> to vector<2x3x3xf32>
    %54 = arith.mulf %52, %53 : vector<2x3x3xf32>
    %55 = arith.addf %45, %54 : vector<2x3x3xf32>
    %c0_i32_17 = arith.constant 0 : i32
    %56 = vector.broadcast %c0_i32_17 : i32 to vector<2x3x3xi32>
    %57 = arith.cmpi eq, %35, %56 : vector<2x3x3xi32>
    %c2_i32 = arith.constant 2 : i32
    %58 = vector.broadcast %c2_i32 : i32 to vector<2x3x3xi32>
    %59 = arith.cmpi eq, %36, %58 : vector<2x3x3xi32>
    %60 = arith.andi %57, %59 : vector<2x3x3xi1>
    %61 = arith.extui %60 : vector<2x3x3xi1> to vector<2x3x3xi32>
    %62 = arith.sitofp %61 : vector<2x3x3xi32> to vector<2x3x3xf32>
    %63 = vector.broadcast %30 : vector<2x1x1xf32> to vector<2x3x3xf32>
    %64 = arith.mulf %62, %63 : vector<2x3x3xf32>
    %65 = arith.addf %55, %64 : vector<2x3x3xf32>
    %c1_i32_18 = arith.constant 1 : i32
    %66 = vector.broadcast %c1_i32_18 : i32 to vector<2x3x3xi32>
    %67 = arith.cmpi eq, %35, %66 : vector<2x3x3xi32>
    %c2_i32_19 = arith.constant 2 : i32
    %68 = vector.broadcast %c2_i32_19 : i32 to vector<2x3x3xi32>
    %69 = arith.cmpi eq, %36, %68 : vector<2x3x3xi32>
    %70 = arith.andi %67, %69 : vector<2x3x3xi1>
    %71 = arith.extui %70 : vector<2x3x3xi1> to vector<2x3x3xi32>
    %72 = arith.sitofp %71 : vector<2x3x3xi32> to vector<2x3x3xf32>
    %73 = vector.broadcast %34 : vector<2x1x1xf32> to vector<2x3x3xf32>
    %74 = arith.mulf %72, %73 : vector<2x3x3xf32>
    %75 = arith.addf %65, %74 : vector<2x3x3xf32>
    %c2_i32_20 = arith.constant 2 : i32
    %76 = vector.broadcast %c2_i32_20 : i32 to vector<2x3x3xi32>
    %77 = arith.cmpi eq, %35, %76 : vector<2x3x3xi32>
    %c2_i32_21 = arith.constant 2 : i32
    %78 = vector.broadcast %c2_i32_21 : i32 to vector<2x3x3xi32>
    %79 = arith.cmpi eq, %36, %78 : vector<2x3x3xi32>
    %80 = arith.andi %77, %79 : vector<2x3x3xi1>
    %81 = arith.extui %80 : vector<2x3x3xi1> to vector<2x3x3xi32>
    %82 = arith.sitofp %81 : vector<2x3x3xi32> to vector<2x3x3xf32>
    %83 = arith.addf %75, %82 : vector<2x3x3xf32>
    %c0_22 = arith.constant 0 : index
    %c0_23 = arith.constant 0 : index
    %c0_24 = arith.constant 0 : index
    %84 = vector.load %arg9[%c0_22, %c0_23, %c0_24] : memref<2x3x3xf32, #tpu.memory_space<vmem>>, vector<2x3x3xf32>
    tpu.vector_store %arg9[%c0_22, %c0_23, %c0_24], %83 {strides = array<i32>} : memref<2x3x3xf32, #tpu.memory_space<vmem>>, vector<2x3x3xf32>,
    %c0_25 = arith.constant 0 : index
    %c0_26 = arith.constant 0 : index
    %c0_27 = arith.constant 0 : index
    %85 = vector.load %arg3[%c0_25, %c0_26, %c0_27] : memref<2x8x3xf32, #tpu.memory_space<vmem>>, vector<2x8x3xf32>
    %c0_28 = arith.constant 0 : index
    %c0_29 = arith.constant 0 : index
    %c0_30 = arith.constant 0 : index
    %86 = vector.load %arg5[%c0_28, %c0_29, %c0_30] : memref<2x3x4xf32, #tpu.memory_space<vmem>>, vector<2x3x4xf32>
    %c0_31 = arith.constant 0 : index
    %c0_32 = arith.constant 0 : index
    %c0_33 = arith.constant 0 : index
    %87 = vector.load %arg6[%c0_31, %c0_32, %c0_33] : memref<2x1x3xf32, #tpu.memory_space<vmem>>, vector<2x1x3xf32>
    %88 = vector.extract_strided_slice %85 {offsets = [0, 0, 0], sizes = [2, 8, 1], strides = [1, 1, 1]} : vector<2x8x3xf32> to vector<2x8x1xf32>
    %89 = vector.extract_strided_slice %86 {offsets = [0, 0, 0], sizes = [2, 1, 4], strides = [1, 1, 1]} : vector<2x3x4xf32> to vector<2x1x4xf32>
    %90 = vector.broadcast %88 : vector<2x8x1xf32> to vector<2x8x4xf32>
    %91 = vector.broadcast %89 : vector<2x1x4xf32> to vector<2x8x4xf32>
    %92 = arith.mulf %90, %91 : vector<2x8x4xf32>
    %93 = vector.extract_strided_slice %85 {offsets = [0, 0, 1], sizes = [2, 8, 1], strides = [1, 1, 1]} : vector<2x8x3xf32> to vector<2x8x1xf32>
    %94 = vector.extract_strided_slice %86 {offsets = [0, 1, 0], sizes = [2, 1, 4], strides = [1, 1, 1]} : vector<2x3x4xf32> to vector<2x1x4xf32>
    %95 = vector.broadcast %93 : vector<2x8x1xf32> to vector<2x8x4xf32>
    %96 = vector.broadcast %94 : vector<2x1x4xf32> to vector<2x8x4xf32>
    %97 = arith.mulf %95, %96 : vector<2x8x4xf32>
    %98 = arith.addf %92, %97 : vector<2x8x4xf32>
    %99 = vector.extract_strided_slice %85 {offsets = [0, 0, 2], sizes = [2, 8, 1], strides = [1, 1, 1]} : vector<2x8x3xf32> to vector<2x8x1xf32>
    %100 = vector.extract_strided_slice %86 {offsets = [0, 2, 0], sizes = [2, 1, 4], strides = [1, 1, 1]} : vector<2x3x4xf32> to vector<2x1x4xf32>
    %101 = vector.broadcast %99 : vector<2x8x1xf32> to vector<2x8x4xf32>
    %102 = vector.broadcast %100 : vector<2x1x4xf32> to vector<2x8x4xf32>
    %103 = arith.mulf %101, %102 : vector<2x8x4xf32>
    %104 = arith.addf %98, %103 : vector<2x8x4xf32>
    %cst_34 = arith.constant 1.000000e+00 : f32
    %105 = vector.broadcast %cst_34 : f32 to vector<2x8x4xf32>
    %106 = arith.subf %105, %104 : vector<2x8x4xf32>
    %c0_35 = arith.constant 0 : index
    %c0_36 = arith.constant 0 : index
    %c0_37 = arith.constant 0 : index
    %107 = vector.load %arg10[%c0_35, %c0_36, %c0_37] : memref<2x8x4xf32, #tpu.memory_space<vmem>>, vector<2x8x4xf32>
    tpu.vector_store %arg10[%c0_35, %c0_36, %c0_37], %106 {strides = array<i32>} : memref<2x8x4xf32, #tpu.memory_space<vmem>>, vector<2x8x4xf32>,
    %108 = vector.extract_strided_slice %85 {offsets = [0, 0, 0], sizes = [2, 8, 1], strides = [1, 1, 1]} : vector<2x8x3xf32> to vector<2x8x1xf32>
    %109 = vector.extract_strided_slice %87 {offsets = [0, 0, 0], sizes = [2, 1, 1], strides = [1, 1, 1]} : vector<2x1x3xf32> to vector<2x1x1xf32>
    %110 = vector.broadcast %109 : vector<2x1x1xf32> to vector<2x8x1xf32>
    %111 = arith.mulf %108, %110 : vector<2x8x1xf32>
    %112 = vector.extract_strided_slice %85 {offsets = [0, 0, 1], sizes = [2, 8, 1], strides = [1, 1, 1]} : vector<2x8x3xf32> to vector<2x8x1xf32>
    %113 = vector.extract_strided_slice %87 {offsets = [0, 0, 1], sizes = [2, 1, 1], strides = [1, 1, 1]} : vector<2x1x3xf32> to vector<2x1x1xf32>
    %114 = vector.broadcast %113 : vector<2x1x1xf32> to vector<2x8x1xf32>
    %115 = arith.mulf %112, %114 : vector<2x8x1xf32>
    %116 = arith.addf %111, %115 : vector<2x8x1xf32>
    %117 = vector.extract_strided_slice %85 {offsets = [0, 0, 2], sizes = [2, 8, 1], strides = [1, 1, 1]} : vector<2x8x3xf32> to vector<2x8x1xf32>
    %118 = vector.extract_strided_slice %87 {offsets = [0, 0, 2], sizes = [2, 1, 1], strides = [1, 1, 1]} : vector<2x1x3xf32> to vector<2x1x1xf32>
    %119 = vector.broadcast %118 : vector<2x1x1xf32> to vector<2x8x1xf32>
    %120 = arith.mulf %117, %119 : vector<2x8x1xf32>
    %121 = arith.addf %116, %120 : vector<2x8x1xf32>
    %c0_38 = arith.constant 0 : index
    %c0_39 = arith.constant 0 : index
    %c0_40 = arith.constant 0 : index
    %122 = vector.load %arg4[%c0_38, %c0_39, %c0_40] : memref<2x8x1xf32, #tpu.memory_space<vmem>>, vector<2x8x1xf32>
    %123 = arith.addf %121, %122 : vector<2x8x1xf32>
    %124 = arith.mulf %123, %123 : vector<2x8x1xf32>
    %c0_41 = arith.constant 0 : index
    %c0_42 = arith.constant 0 : index
    %c0_43 = arith.constant 0 : index
    %125 = vector.load %arg11[%c0_41, %c0_42, %c0_43] : memref<2x8x1xf32, #tpu.memory_space<vmem>>, vector<2x8x1xf32>
    tpu.vector_store %arg11[%c0_41, %c0_42, %c0_43], %124 {strides = array<i32>} : memref<2x8x1xf32, #tpu.memory_space<vmem>>, vector<2x8x1xf32>,
    %c0_44 = arith.constant 0 : index
    %c0_45 = arith.constant 0 : index
    %c0_46 = arith.constant 0 : index
    %126 = vector.load %arg7[%c0_44, %c0_45, %c0_46] : memref<2x1x3xf32, #tpu.memory_space<vmem>>, vector<2x1x3xf32>
    %127 = vector.extract_strided_slice %126 {offsets = [0, 0, 0], sizes = [2, 1, 1], strides = [1, 1, 1]} : vector<2x1x3xf32> to vector<2x1x1xf32>
    %cst_47 = arith.constant 2.000000e+00 : f32
    %128 = vector.broadcast %cst_47 : f32 to vector<2x1x1xf32>
    %129 = arith.mulf %128, %127 : vector<2x1x1xf32>
    %130 = vector.extract_strided_slice %126 {offsets = [0, 0, 0], sizes = [2, 1, 1], strides = [1, 1, 1]} : vector<2x1x3xf32> to vector<2x1x1xf32>
    %131 = arith.mulf %129, %130 : vector<2x1x1xf32>
    %cst_48 = arith.constant 1.000000e+00 : f32
    %132 = vector.broadcast %cst_48 : f32 to vector<2x1x1xf32>
    %133 = arith.subf %132, %131 : vector<2x1x1xf32>
    %134 = vector.extract_strided_slice %126 {offsets = [0, 0, 0], sizes = [2, 1, 1], strides = [1, 1, 1]} : vector<2x1x3xf32> to vector<2x1x1xf32>
    %cst_49 = arith.constant 2.000000e+00 : f32
    %135 = vector.broadcast %cst_49 : f32 to vector<2x1x1xf32>
    %136 = arith.mulf %135, %134 : vector<2x1x1xf32>
    %137 = vector.extract_strided_slice %126 {offsets = [0, 0, 1], sizes = [2, 1, 1], strides = [1, 1, 1]} : vector<2x1x3xf32> to vector<2x1x1xf32>
    %138 = arith.mulf %136, %137 : vector<2x1x1xf32>
    %cst_50 = arith.constant 0.000000e+00 : f32
    %139 = vector.broadcast %cst_50 : f32 to vector<2x1x1xf32>
    %140 = arith.subf %139, %138 : vector<2x1x1xf32>
    %141 = vector.extract_strided_slice %126 {offsets = [0, 0, 0], sizes = [2, 1, 1], strides = [1, 1, 1]} : vector<2x1x3xf32> to vector<2x1x1xf32>
    %cst_51 = arith.constant 2.000000e+00 : f32
    %142 = vector.broadcast %cst_51 : f32 to vector<2x1x1xf32>
    %143 = arith.mulf %142, %141 : vector<2x1x1xf32>
    %144 = vector.extract_strided_slice %126 {offsets = [0, 0, 2], sizes = [2, 1, 1], strides = [1, 1, 1]} : vector<2x1x3xf32> to vector<2x1x1xf32>
    %145 = arith.mulf %143, %144 : vector<2x1x1xf32>
    %cst_52 = arith.constant 0.000000e+00 : f32
    %146 = vector.broadcast %cst_52 : f32 to vector<2x1x1xf32>
    %147 = arith.subf %146, %145 : vector<2x1x1xf32>
    %148 = vector.extract_strided_slice %126 {offsets = [0, 0, 1], sizes = [2, 1, 1], strides = [1, 1, 1]} : vector<2x1x3xf32> to vector<2x1x1xf32>
    %cst_53 = arith.constant 2.000000e+00 : f32
    %149 = vector.broadcast %cst_53 : f32 to vector<2x1x1xf32>
    %150 = arith.mulf %149, %148 : vector<2x1x1xf32>
    %151 = vector.extract_strided_slice %126 {offsets = [0, 0, 0], sizes = [2, 1, 1], strides = [1, 1, 1]} : vector<2x1x3xf32> to vector<2x1x1xf32>
    %152 = arith.mulf %150, %151 : vector<2x1x1xf32>
    %cst_54 = arith.constant 0.000000e+00 : f32
    %153 = vector.broadcast %cst_54 : f32 to vector<2x1x1xf32>
    %154 = arith.subf %153, %152 : vector<2x1x1xf32>
    %155 = vector.extract_strided_slice %126 {offsets = [0, 0, 1], sizes = [2, 1, 1], strides = [1, 1, 1]} : vector<2x1x3xf32> to vector<2x1x1xf32>
    %cst_55 = arith.constant 2.000000e+00 : f32
    %156 = vector.broadcast %cst_55 : f32 to vector<2x1x1xf32>
    %157 = arith.mulf %156, %155 : vector<2x1x1xf32>
    %158 = vector.extract_strided_slice %126 {offsets = [0, 0, 1], sizes = [2, 1, 1], strides = [1, 1, 1]} : vector<2x1x3xf32> to vector<2x1x1xf32>
    %159 = arith.mulf %157, %158 : vector<2x1x1xf32>
    %cst_56 = arith.constant 1.000000e+00 : f32
    %160 = vector.broadcast %cst_56 : f32 to vector<2x1x1xf32>
    %161 = arith.subf %160, %159 : vector<2x1x1xf32>
    %162 = vector.extract_strided_slice %126 {offsets = [0, 0, 1], sizes = [2, 1, 1], strides = [1, 1, 1]} : vector<2x1x3xf32> to vector<2x1x1xf32>
    %cst_57 = arith.constant 2.000000e+00 : f32
    %163 = vector.broadcast %cst_57 : f32 to vector<2x1x1xf32>
    %164 = arith.mulf %163, %162 : vector<2x1x1xf32>
    %165 = vector.extract_strided_slice %126 {offsets = [0, 0, 2], sizes = [2, 1, 1], strides = [1, 1, 1]} : vector<2x1x3xf32> to vector<2x1x1xf32>
    %166 = arith.mulf %164, %165 : vector<2x1x1xf32>
    %cst_58 = arith.constant 0.000000e+00 : f32
    %167 = vector.broadcast %cst_58 : f32 to vector<2x1x1xf32>
    %168 = arith.subf %167, %166 : vector<2x1x1xf32>
    %169 = vector.extract_strided_slice %126 {offsets = [0, 0, 2], sizes = [2, 1, 1], strides = [1, 1, 1]} : vector<2x1x3xf32> to vector<2x1x1xf32>
    %cst_59 = arith.constant 2.000000e+00 : f32
    %170 = vector.broadcast %cst_59 : f32 to vector<2x1x1xf32>
    %171 = arith.mulf %170, %169 : vector<2x1x1xf32>
    %172 = vector.extract_strided_slice %126 {offsets = [0, 0, 0], sizes = [2, 1, 1], strides = [1, 1, 1]} : vector<2x1x3xf32> to vector<2x1x1xf32>
    %173 = arith.mulf %171, %172 : vector<2x1x1xf32>
    %cst_60 = arith.constant 0.000000e+00 : f32
    %174 = vector.broadcast %cst_60 : f32 to vector<2x1x1xf32>
    %175 = arith.subf %174, %173 : vector<2x1x1xf32>
    %176 = vector.extract_strided_slice %126 {offsets = [0, 0, 2], sizes = [2, 1, 1], strides = [1, 1, 1]} : vector<2x1x3xf32> to vector<2x1x1xf32>
    %cst_61 = arith.constant 2.000000e+00 : f32
    %177 = vector.broadcast %cst_61 : f32 to vector<2x1x1xf32>
    %178 = arith.mulf %177, %176 : vector<2x1x1xf32>
    %179 = vector.extract_strided_slice %126 {offsets = [0, 0, 1], sizes = [2, 1, 1], strides = [1, 1, 1]} : vector<2x1x3xf32> to vector<2x1x1xf32>
    %180 = arith.mulf %178, %179 : vector<2x1x1xf32>
    %cst_62 = arith.constant 0.000000e+00 : f32
    %181 = vector.broadcast %cst_62 : f32 to vector<2x1x1xf32>
    %182 = arith.subf %181, %180 : vector<2x1x1xf32>
    %183 = vector.extract_strided_slice %126 {offsets = [0, 0, 2], sizes = [2, 1, 1], strides = [1, 1, 1]} : vector<2x1x3xf32> to vector<2x1x1xf32>
    %cst_63 = arith.constant 2.000000e+00 : f32
    %184 = vector.broadcast %cst_63 : f32 to vector<2x1x1xf32>
    %185 = arith.mulf %184, %183 : vector<2x1x1xf32>
    %186 = vector.extract_strided_slice %126 {offsets = [0, 0, 2], sizes = [2, 1, 1], strides = [1, 1, 1]} : vector<2x1x3xf32> to vector<2x1x1xf32>
    %187 = arith.mulf %185, %186 : vector<2x1x1xf32>
    %cst_64 = arith.constant 1.000000e+00 : f32
    %188 = vector.broadcast %cst_64 : f32 to vector<2x1x1xf32>
    %189 = arith.subf %188, %187 : vector<2x1x1xf32>
    %190 = tpu.iota {dimensions = array<i32: 1>} : vector<2x3x3xi32>
    %191 = tpu.iota {dimensions = array<i32: 2>} : vector<2x3x3xi32>
    %cst_65 = arith.constant 0.000000e+00 : f32
    %192 = vector.broadcast %cst_65 : f32 to vector<2x3x3xf32>
    %c0_i32_66 = arith.constant 0 : i32
    %193 = vector.broadcast %c0_i32_66 : i32 to vector<2x3x3xi32>
    %194 = arith.cmpi eq, %190, %193 : vector<2x3x3xi32>
    %c0_i32_67 = arith.constant 0 : i32
    %195 = vector.broadcast %c0_i32_67 : i32 to vector<2x3x3xi32>
    %196 = arith.cmpi eq, %191, %195 : vector<2x3x3xi32>
    %197 = arith.andi %194, %196 : vector<2x3x3xi1>
    %198 = arith.extui %197 : vector<2x3x3xi1> to vector<2x3x3xi32>
    %199 = arith.sitofp %198 : vector<2x3x3xi32> to vector<2x3x3xf32>
    %200 = vector.broadcast %133 : vector<2x1x1xf32> to vector<2x3x3xf32>
    %201 = arith.mulf %199, %200 : vector<2x3x3xf32>
    %202 = arith.addf %192, %201 : vector<2x3x3xf32>
    %c0_i32_68 = arith.constant 0 : i32
    %203 = vector.broadcast %c0_i32_68 : i32 to vector<2x3x3xi32>
    %204 = arith.cmpi eq, %190, %203 : vector<2x3x3xi32>
    %c1_i32_69 = arith.constant 1 : i32
    %205 = vector.broadcast %c1_i32_69 : i32 to vector<2x3x3xi32>
    %206 = arith.cmpi eq, %191, %205 : vector<2x3x3xi32>
    %207 = arith.andi %204, %206 : vector<2x3x3xi1>
    %208 = arith.extui %207 : vector<2x3x3xi1> to vector<2x3x3xi32>
    %209 = arith.sitofp %208 : vector<2x3x3xi32> to vector<2x3x3xf32>
    %210 = vector.broadcast %140 : vector<2x1x1xf32> to vector<2x3x3xf32>
    %211 = arith.mulf %209, %210 : vector<2x3x3xf32>
    %212 = arith.addf %202, %211 : vector<2x3x3xf32>
    %c0_i32_70 = arith.constant 0 : i32
    %213 = vector.broadcast %c0_i32_70 : i32 to vector<2x3x3xi32>
    %214 = arith.cmpi eq, %190, %213 : vector<2x3x3xi32>
    %c2_i32_71 = arith.constant 2 : i32
    %215 = vector.broadcast %c2_i32_71 : i32 to vector<2x3x3xi32>
    %216 = arith.cmpi eq, %191, %215 : vector<2x3x3xi32>
    %217 = arith.andi %214, %216 : vector<2x3x3xi1>
    %218 = arith.extui %217 : vector<2x3x3xi1> to vector<2x3x3xi32>
    %219 = arith.sitofp %218 : vector<2x3x3xi32> to vector<2x3x3xf32>
    %220 = vector.broadcast %147 : vector<2x1x1xf32> to vector<2x3x3xf32>
    %221 = arith.mulf %219, %220 : vector<2x3x3xf32>
    %222 = arith.addf %212, %221 : vector<2x3x3xf32>
    %c1_i32_72 = arith.constant 1 : i32
    %223 = vector.broadcast %c1_i32_72 : i32 to vector<2x3x3xi32>
    %224 = arith.cmpi eq, %190, %223 : vector<2x3x3xi32>
    %c0_i32_73 = arith.constant 0 : i32
    %225 = vector.broadcast %c0_i32_73 : i32 to vector<2x3x3xi32>
    %226 = arith.cmpi eq, %191, %225 : vector<2x3x3xi32>
    %227 = arith.andi %224, %226 : vector<2x3x3xi1>
    %228 = arith.extui %227 : vector<2x3x3xi1> to vector<2x3x3xi32>
    %229 = arith.sitofp %228 : vector<2x3x3xi32> to vector<2x3x3xf32>
    %230 = vector.broadcast %154 : vector<2x1x1xf32> to vector<2x3x3xf32>
    %231 = arith.mulf %229, %230 : vector<2x3x3xf32>
    %232 = arith.addf %222, %231 : vector<2x3x3xf32>
    %c1_i32_74 = arith.constant 1 : i32
    %233 = vector.broadcast %c1_i32_74 : i32 to vector<2x3x3xi32>
    %234 = arith.cmpi eq, %190, %233 : vector<2x3x3xi32>
    %c1_i32_75 = arith.constant 1 : i32
    %235 = vector.broadcast %c1_i32_75 : i32 to vector<2x3x3xi32>
    %236 = arith.cmpi eq, %191, %235 : vector<2x3x3xi32>
    %237 = arith.andi %234, %236 : vector<2x3x3xi1>
    %238 = arith.extui %237 : vector<2x3x3xi1> to vector<2x3x3xi32>
    %239 = arith.sitofp %238 : vector<2x3x3xi32> to vector<2x3x3xf32>
    %240 = vector.broadcast %161 : vector<2x1x1xf32> to vector<2x3x3xf32>
    %241 = arith.mulf %239, %240 : vector<2x3x3xf32>
    %242 = arith.addf %232, %241 : vector<2x3x3xf32>
    %c1_i32_76 = arith.constant 1 : i32
    %243 = vector.broadcast %c1_i32_76 : i32 to vector<2x3x3xi32>
    %244 = arith.cmpi eq, %190, %243 : vector<2x3x3xi32>
    %c2_i32_77 = arith.constant 2 : i32
    %245 = vector.broadcast %c2_i32_77 : i32 to vector<2x3x3xi32>
    %246 = arith.cmpi eq, %191, %245 : vector<2x3x3xi32>
    %247 = arith.andi %244, %246 : vector<2x3x3xi1>
    %248 = arith.extui %247 : vector<2x3x3xi1> to vector<2x3x3xi32>
    %249 = arith.sitofp %248 : vector<2x3x3xi32> to vector<2x3x3xf32>
    %250 = vector.broadcast %168 : vector<2x1x1xf32> to vector<2x3x3xf32>
    %251 = arith.mulf %249, %250 : vector<2x3x3xf32>
    %252 = arith.addf %242, %251 : vector<2x3x3xf32>
    %c2_i32_78 = arith.constant 2 : i32
    %253 = vector.broadcast %c2_i32_78 : i32 to vector<2x3x3xi32>
    %254 = arith.cmpi eq, %190, %253 : vector<2x3x3xi32>
    %c0_i32_79 = arith.constant 0 : i32
    %255 = vector.broadcast %c0_i32_79 : i32 to vector<2x3x3xi32>
    %256 = arith.cmpi eq, %191, %255 : vector<2x3x3xi32>
    %257 = arith.andi %254, %256 : vector<2x3x3xi1>
    %258 = arith.extui %257 : vector<2x3x3xi1> to vector<2x3x3xi32>
    %259 = arith.sitofp %258 : vector<2x3x3xi32> to vector<2x3x3xf32>
    %260 = vector.broadcast %175 : vector<2x1x1xf32> to vector<2x3x3xf32>
    %261 = arith.mulf %259, %260 : vector<2x3x3xf32>
    %262 = arith.addf %252, %261 : vector<2x3x3xf32>
    %c2_i32_80 = arith.constant 2 : i32
    %263 = vector.broadcast %c2_i32_80 : i32 to vector<2x3x3xi32>
    %264 = arith.cmpi eq, %190, %263 : vector<2x3x3xi32>
    %c1_i32_81 = arith.constant 1 : i32
    %265 = vector.broadcast %c1_i32_81 : i32 to vector<2x3x3xi32>
    %266 = arith.cmpi eq, %191, %265 : vector<2x3x3xi32>
    %267 = arith.andi %264, %266 : vector<2x3x3xi1>
    %268 = arith.extui %267 : vector<2x3x3xi1> to vector<2x3x3xi32>
    %269 = arith.sitofp %268 : vector<2x3x3xi32> to vector<2x3x3xf32>
    %270 = vector.broadcast %182 : vector<2x1x1xf32> to vector<2x3x3xf32>
    %271 = arith.mulf %269, %270 : vector<2x3x3xf32>
    %272 = arith.addf %262, %271 : vector<2x3x3xf32>
    %c2_i32_82 = arith.constant 2 : i32
    %273 = vector.broadcast %c2_i32_82 : i32 to vector<2x3x3xi32>
    %274 = arith.cmpi eq, %190, %273 : vector<2x3x3xi32>
    %c2_i32_83 = arith.constant 2 : i32
    %275 = vector.broadcast %c2_i32_83 : i32 to vector<2x3x3xi32>
    %276 = arith.cmpi eq, %191, %275 : vector<2x3x3xi32>
    %277 = arith.andi %274, %276 : vector<2x3x3xi1>
    %278 = arith.extui %277 : vector<2x3x3xi1> to vector<2x3x3xi32>
    %279 = arith.sitofp %278 : vector<2x3x3xi32> to vector<2x3x3xf32>
    %280 = vector.broadcast %189 : vector<2x1x1xf32> to vector<2x3x3xf32>
    %281 = arith.mulf %279, %280 : vector<2x3x3xf32>
    %282 = arith.addf %272, %281 : vector<2x3x3xf32>
    %c0_84 = arith.constant 0 : index
    %c0_85 = arith.constant 0 : index
    %c0_86 = arith.constant 0 : index
    %283 = vector.load %arg12[%c0_84, %c0_85, %c0_86] : memref<2x3x3xf32, #tpu.memory_space<vmem>>, vector<2x3x3xf32>
    tpu.vector_store %arg12[%c0_84, %c0_85, %c0_86], %282 {strides = array<i32>} : memref<2x3x3xf32, #tpu.memory_space<vmem>>, vector<2x3x3xf32>,
    %c0_87 = arith.constant 0 : index
    %c0_88 = arith.constant 0 : index
    %c0_89 = arith.constant 0 : index
    %284 = vector.load %arg8[%c0_87, %c0_88, %c0_89] : memref<2x3x128xf32, #tpu.memory_space<vmem>>, vector<2x3x128xf32>
    %285 = vector.extract_strided_slice %284 {offsets = [0, 0, 0], sizes = [2, 1, 128], strides = [1, 1, 1]} : vector<2x3x128xf32> to vector<2x1x128xf32>
    %286 = vector.extract_strided_slice %87 {offsets = [0, 0, 0], sizes = [2, 1, 1], strides = [1, 1, 1]} : vector<2x1x3xf32> to vector<2x1x1xf32>
    %287 = vector.broadcast %286 : vector<2x1x1xf32> to vector<2x1x128xf32>
    %288 = arith.subf %285, %287 : vector<2x1x128xf32>
    %289 = vector.extract_strided_slice %284 {offsets = [0, 1, 0], sizes = [2, 1, 128], strides = [1, 1, 1]} : vector<2x3x128xf32> to vector<2x1x128xf32>
    %290 = vector.extract_strided_slice %87 {offsets = [0, 0, 1], sizes = [2, 1, 1], strides = [1, 1, 1]} : vector<2x1x3xf32> to vector<2x1x1xf32>
    %291 = vector.broadcast %290 : vector<2x1x1xf32> to vector<2x1x128xf32>
    %292 = arith.subf %289, %291 : vector<2x1x128xf32>
    %293 = vector.extract_strided_slice %284 {offsets = [0, 2, 0], sizes = [2, 1, 128], strides = [1, 1, 1]} : vector<2x3x128xf32> to vector<2x1x128xf32>
    %294 = vector.extract_strided_slice %87 {offsets = [0, 0, 2], sizes = [2, 1, 1], strides = [1, 1, 1]} : vector<2x1x3xf32> to vector<2x1x1xf32>
    %295 = vector.broadcast %294 : vector<2x1x1xf32> to vector<2x1x128xf32>
    %296 = arith.subf %293, %295 : vector<2x1x128xf32>
    %297 = vector.extract_strided_slice %87 {offsets = [0, 0, 0], sizes = [2, 1, 1], strides = [1, 1, 1]} : vector<2x1x3xf32> to vector<2x1x1xf32>
    %298 = vector.broadcast %133 : vector<2x1x1xf32> to vector<2x1x128xf32>
    %299 = arith.mulf %298, %288 : vector<2x1x128xf32>
    %300 = vector.broadcast %297 : vector<2x1x1xf32> to vector<2x1x128xf32>
    %301 = arith.addf %300, %299 : vector<2x1x128xf32>
    %302 = vector.broadcast %140 : vector<2x1x1xf32> to vector<2x1x128xf32>
    %303 = arith.mulf %302, %292 : vector<2x1x128xf32>
    %304 = arith.addf %301, %303 : vector<2x1x128xf32>
    %305 = vector.broadcast %147 : vector<2x1x1xf32> to vector<2x1x128xf32>
    %306 = arith.mulf %305, %296 : vector<2x1x128xf32>
    %307 = arith.addf %304, %306 : vector<2x1x128xf32>
    %308 = vector.extract_strided_slice %87 {offsets = [0, 0, 1], sizes = [2, 1, 1], strides = [1, 1, 1]} : vector<2x1x3xf32> to vector<2x1x1xf32>
    %309 = vector.broadcast %154 : vector<2x1x1xf32> to vector<2x1x128xf32>
    %310 = arith.mulf %309, %288 : vector<2x1x128xf32>
    %311 = vector.broadcast %308 : vector<2x1x1xf32> to vector<2x1x128xf32>
    %312 = arith.addf %311, %310 : vector<2x1x128xf32>
    %313 = vector.broadcast %161 : vector<2x1x1xf32> to vector<2x1x128xf32>
    %314 = arith.mulf %313, %292 : vector<2x1x128xf32>
    %315 = arith.addf %312, %314 : vector<2x1x128xf32>
    %316 = vector.broadcast %168 : vector<2x1x1xf32> to vector<2x1x128xf32>
    %317 = arith.mulf %316, %296 : vector<2x1x128xf32>
    %318 = arith.addf %315, %317 : vector<2x1x128xf32>
    %319 = vector.extract_strided_slice %87 {offsets = [0, 0, 2], sizes = [2, 1, 1], strides = [1, 1, 1]} : vector<2x1x3xf32> to vector<2x1x1xf32>
    %320 = vector.broadcast %175 : vector<2x1x1xf32> to vector<2x1x128xf32>
    %321 = arith.mulf %320, %288 : vector<2x1x128xf32>
    %322 = vector.broadcast %319 : vector<2x1x1xf32> to vector<2x1x128xf32>
    %323 = arith.addf %322, %321 : vector<2x1x128xf32>
    %324 = vector.broadcast %182 : vector<2x1x1xf32> to vector<2x1x128xf32>
    %325 = arith.mulf %324, %292 : vector<2x1x128xf32>
    %326 = arith.addf %323, %325 : vector<2x1x128xf32>
    %327 = vector.broadcast %189 : vector<2x1x1xf32> to vector<2x1x128xf32>
    %328 = arith.mulf %327, %296 : vector<2x1x128xf32>
    %329 = arith.addf %326, %328 : vector<2x1x128xf32>
    %330 = tpu.concatenate %307, %318, %329 in 1 : vector<2x1x128xf32>, vector<2x1x128xf32>, vector<2x1x128xf32> -> vector<2x3x128xf32>
    %c0_90 = arith.constant 0 : index
    %c0_91 = arith.constant 0 : index
    %c0_92 = arith.constant 0 : index
    %331 = vector.load %arg13[%c0_90, %c0_91, %c0_92] : memref<2x3x128xf32, #tpu.memory_space<vmem>>, vector<2x3x128xf32>
    tpu.vector_store %arg13[%c0_90, %c0_91, %c0_92], %330 {strides = array<i32>} : memref<2x3x128xf32, #tpu.memory_space<vmem>>, vector<2x3x128xf32>,
    return
  }
}

</mosaic_0001>

<bundles_post_ra>
// kernel: graph_heads_fused.1
= control target key start
LH: loop header
LB: loop body
LE: loop exit
PB: predicated region body
PF: predicated region fallthrough
CT: control target
= control target key end

     0   :  { %19 = vsyncpa [#allocation3], 0  ;;  %s1184_s25 = smov [#allocation2]   ;;  %s1783_s0 = inlined_call_operand.hbm [shape: f32[2,64,768], index: 0, kind: input, shape index: {}]   ;;  %s1784_s1 = inlined_call_operand.vmem [shape: f32[3,768], index: 1, kind: input, shape index: {}]   ;;  %s1785_s2 = inlined_call_operand.vmem [shape: f32[1,3], index: 2, kind: input, shape index: {}]   ;;  %s1786_s3 = inlined_call_operand.vmem [shape: f32[2,8,3], index: 3, kind: input, shape index: {}]   ;;  %s1787_s4 = inlined_call_operand.vmem [shape: f32[2,8,1], index: 4, kind: input, shape index: {}]   ;;  %s1788_s5 = inlined_call_operand.vmem [shape: f32[2,3,4], index: 5, kind: input, shape index: {}]   ;;  %s1789_s6 = inlined_call_operand.vmem [shape: f32[2,1,3], index: 6, kind: input, shape index: {}]   ;;  %s1790_s7 = inlined_call_operand.vmem [shape: f32[2,1,3], index: 7, kind: input, shape index: {}]   ;;  %s1791_s8 = inlined_call_operand.vmem [shape: f32[2,3,128], index: 8, kind: input, shape index: {}]   ;;  %s1792_s9 = inlined_call_operand.vmem [shape: f32[2,3,3], index: 9, kind: output, shape index: {0}]   ;;  %s1793_s10 = inlined_call_operand.vmem [shape: f32[2,8,4], index: 10, kind: output, shape index: {1}]   ;;  %s1794_s11 = inlined_call_operand.vmem [shape: f32[2,8,1], index: 11, kind: output, shape index: {2}]   ;;  %s1795_s12 = inlined_call_operand.vmem [shape: f32[2,3,3], index: 12, kind: output, shape index: {3}]   ;;  %s1796_s13 = inlined_call_operand.vmem [shape: f32[2,3,128], index: 13, kind: output, shape index: {4}]  }
   0x1   :  { %s25_s26 = sshll.u32 %s1184_s25, 4  ;;  %s1160_s29 = scalar_lea.hbm %s1783_s0, 12288  ;;  %s26_s26 = int_to_ptr.vmem [resolvable:$true] %s25_s26 }
   0x2   :  { %p1161_p0 = scmp.ne.s32.totalorder %s1783_s0, %s1160_s29  ;;  %p1164_p1 = scmp.lt.u32.totalorder %s1160_s29, %s1783_s0 }
   0x4   :  { %p1166_p2 = pnand %p1164_p1, %p1161_p0 }
   0x6   :  { %1169 = shalt.err (!%p1166_p2)
}
   0x7   :  { %s1170_s17 = scalar_lea.vmem %s26_s26, 12288  ;;  %p1175_p4 = scmp.lt.s32.totalorder %s26_s26, %s26_s26 }
   0x8   :  { %p1171_p3 = scmp.ne.s32.totalorder %s26_s26, %s1170_s17  ;;  %p1176_p5 = scmp.lt.s32.totalorder %s1170_s17, %s1170_s17 }
   0xa   :  { %p1177_p6 = por %p1176_p5, %p1175_p4 }
   0xc   :  { %p1178_p7 = pnand %p1177_p6, %p1171_p3 }
   0xe   :  { %1181 = shalt.err (!%p1178_p7)
}
   0xf   :  { %s1185_s18 = smov 768   ;;  %s1186_s19 = smov 48  }
  0x10   :  { %31 = dma.hbm_to_vmem [thread:$0]  %s1783_s0, 12288, %s26_s26, [#allocation3], %s1185_s18, %s1185_s18, %s1186_s19  }
  0x11   :  { %1182 = dma.done.wait [#allocation3], 12288  }
  0x12   :  { %1183 = vsyncadd [#allocation3], 4294955008  ;;  %v1187_v0 = vmov 0   ;;  %v1106_v1 = vld [vmem:[%s1785_s2] ss:$0 sm:$0xff]  ;;  %v1285_v2 = vld [vmem:[%s1786_s3 + $0x8] sm:$0xff]  ;;  %v391_v4 = vlaneseq }
  0x13   :  { %1127 = vset.pattern.permute.xlu1 %v1187_v0  ;;  %1128 = vset.pattern.permute.xlu0 %v1187_v0  ;;  %v1290_v3 = vld [vmem:[%s1786_s3] sm:$0xff]  ;;  %v52_v6 = vld [vmem:[#allocation2 + $0x8] sm:$0xff]  ;;  %v53_v7 = vld [vmem:[#allocation2 + $0x10] sm:$0xff]  ;;  %v1188_v44 = vmov 1   ;;  %vm341_vm0 = vcmask 1042432   ;;  %s1191_s18 = smov 126  }
  0x14   :  { %373 = vbcast.lane.b32.xlu1 %v1106_v1, 256  ;;  %472 = vperm.xlu0 %1128, %v1285_v2   ;;  %v51_v5 = vld [vmem:[#allocation2] sm:$0xff]  ;;  %v54_v8 = vld [vmem:[#allocation2 + $0x18] sm:$0xff]  ;;  %v56_v10 = vld [vmem:[#allocation2 + $0x28] sm:$0xff]  ;;  %v1295_v18 = vshrl.u32 %v391_v4, 7  ;;  %s1193_s23 = smov 2  }
  0x15   :  { %v55_v9 = vld [vmem:[#allocation2 + $0x20] sm:$0xff]  ;;  %v57_v11 = vld [vmem:[#allocation2 + $0x30] sm:$0xff]  ;;  %v58_v12 = vld [vmem:[#allocation2 + $0x38] sm:$0xff]  ;;  %vm527_vm1 = vcmask 31744   ;;  %vm568_vm2 = vcmask 7168   ;;  %vm456_vm14 = vcmask 18432  }
  0x16   :  { %v59_v13 = vld [vmem:[#allocation2 + $0x40] sm:$0xff]  ;;  %v60_v14 = vld [vmem:[#allocation2 + $0x48] sm:$0xff]  ;;  %v61_v15 = vld [vmem:[#allocation2 + $0x50] sm:$0xff]  ;;  %v147_v16 = vadd.f32 %v57_v11, %v51_v5  ;;  %v160_v17 = vadd.f32 %v58_v12, %v52_v6  ;;  %v1304_v45 = vsub.s32 0, %v1295_v18  ;;  %vm395_vm4 = vcmp.eq.s32.totalorder %v1295_v18, 0 }
  0x17   :  { %v62_v19 = vld [vmem:[#allocation2 + $0x58] sm:$0xff]  ;;  %v63_v20 = vld [vmem:[#allocation2 + $0x60] sm:$0xff]  ;;  %v64_v21 = vld [vmem:[#allocation2 + $0x68] sm:$0xff]  ;;  %v173_v22 = vadd.f32 %v59_v13, %v53_v7  ;;  %v186_v23 = vadd.f32 %v60_v14, %v54_v8  ;;  %v199_v24 = vadd.f32 %v61_v15, %v55_v9  ;;  %vm410_vm7 = vcmp.eq.s32.totalorder %v1295_v18, 1 }
  0x18   :  { %467 = vperm.xlu1 %1127, %v1290_v3   ;;  %v65_v25 = vld [vmem:[#allocation2 + $0x70] sm:$0xff]  ;;  %v66_v26 = vld [vmem:[#allocation2 + $0x78] sm:$0xff]  ;;  %v67_v27 = vld [vmem:[#allocation2 + $0x80] sm:$0xff]  ;;  %v148_v28 = vadd.f32 %v147_v16, %v63_v20  ;;  %v161_v29 = vadd.f32 %v160_v17, %v64_v21  ;;  %v212_v30 = vadd.f32 %v62_v19, %v56_v10  ;;  %vm450_vm12 = vcmp.eq.s32.totalorder %v1295_v18, 2 }
  0x19   :  { %v68_v31 = vld [vmem:[#allocation2 + $0x88] sm:$0xff]  ;;  %v69_v32 = vld [vmem:[#allocation2 + $0x90] sm:$0xff]  ;;  %v70_v33 = vld [vmem:[#allocation2 + $0x98] sm:$0xff]  ;;  %v174_v34 = vadd.f32 %v173_v22, %v65_v25  ;;  %v187_v35 = vadd.f32 %v186_v23, %v66_v26  ;;  %v200_v36 = vadd.f32 %v199_v24, %v67_v27 }
  0x1a   :  { %v1300_v37 = vld [vmem:[%s1789_s6] sm:$0x1]  ;;  %v72_v39 = vld [vmem:[#allocation2 + $0xa8] sm:$0xff]  ;;  %v73_v40 = vld [vmem:[#allocation2 + $0xb0] sm:$0xff]  ;;  %v149_v41 = vadd.f32 %v148_v28, %v69_v32  ;;  %v162_v42 = vadd.f32 %v161_v29, %v70_v33  ;;  %v213_v43 = vadd.f32 %v212_v30, %v68_v31 }
  0x1b   :  { %v71_v38 = vld [vmem:[#allocation2 + $0xa0] sm:$0xff]  ;;  %v74_v46 = vld [vmem:[#allocation2 + $0xb8] sm:$0xff]  ;;  %v76_v48 = vld [vmem:[#allocation2 + $0xc8] sm:$0xff]  ;;  %v188_v50 = vadd.f32 %v187_v35, %v72_v39  ;;  %v201_v51 = vadd.f32 %v200_v36, %v73_v40  ;;  %v535_v10 = vrot.slane %v1300_v37, %v1304_v45 }
  0x1c   :  { %1129 = vset.pattern.permute.xlu1 %v1188_v44  ;;  %v75_v47 = vld [vmem:[#allocation2 + $0xc0] sm:$0xff]  ;;  %v175_v49 = vadd.f32 %v174_v34, %v71_v38  ;;  %v77_v52 = vld [vmem:[#allocation2 + $0xd0] sm:$0xff]  ;;  %v78_v53 = vld [vmem:[#allocation2 + $0xd8] sm:$0xff]  ;;  %v163_v56 = vadd.f32 %v162_v42, %v76_v48  ;;  %v214_v57 = vadd.f32 %v213_v43, %v74_v46  ;;  %v1189_v46 = vmov 2  }
  0x1d   :  { %486 = vperm.xlu1 %1129, %v1290_v3   ;;  %v79_v54 = vld [vmem:[#allocation2 + $0xe0] sm:$0xff]  ;;  %v150_v55 = vadd.f32 %v149_v41, %v75_v47  ;;  %v80_v58 = vld [vmem:[#allocation2 + $0xe8] sm:$0xff]  ;;  %v81_v59 = vld [vmem:[#allocation2 + $0xf0] sm:$0xff]  ;;  %v189_v62 = vadd.f32 %v188_v50, %v78_v53  ;;  %v1311_v36 = vmul.f32 %v535_v10, %v1290_v3 }
  0x1e   :  { %v82_v60 = vld [vmem:[#allocation2 + $0xf8] sm:$0xff]  ;;  %v176_v61 = vadd.f32 %v175_v49, %v77_v52  ;;  %v202_v63 = vadd.f32 %v201_v51, %v79_v54  ;;  %v83_v1 = vld [vmem:[#allocation2 + $0x100] sm:$0xff]  ;;  %v84_v5 = vld [vmem:[#allocation2 + $0x108] sm:$0xff]  ;;  %v215_v9 = vadd.f32 %v214_v57, %v80_v58 }
  0x1f   :  { %v85_v6 = vld [vmem:[#allocation2 + $0x110] sm:$0xff]  ;;  %v151_v7 = vadd.f32 %v150_v55, %v81_v59  ;;  %v164_v8 = vadd.f32 %v163_v56, %v82_v60  ;;  %v86_v11 = vld [vmem:[#allocation2 + $0x118] sm:$0xff]  ;;  %v87_v12 = vld [vmem:[#allocation2 + $0x120] sm:$0xff]  ;;  %v190_v15 = vadd.f32 %v189_v62, %v84_v5 }
  0x20   :  { %v88_v13 = vld [vmem:[#allocation2 + $0x128] sm:$0xff]  ;;  %v177_v14 = vadd.f32 %v176_v61, %v83_v1  ;;  %v203_v16 = vadd.f32 %v202_v63, %v85_v6  ;;  %v89_v17 = vld [vmem:[#allocation2 + $0x130] sm:$0xff]  ;;  %v90_v19 = vld [vmem:[#allocation2 + $0x138] sm:$0xff]  ;;  %v216_v23 = vadd.f32 %v215_v9, %v86_v11 }
  0x21   :  { %490 = vperm.xlu1 %1129, %v1285_v2   ;;  %v91_v20 = vld [vmem:[#allocation2 + $0x140] sm:$0xff]  ;;  %v152_v21 = vadd.f32 %v151_v7, %v87_v12  ;;  %v165_v22 = vadd.f32 %v164_v8, %v88_v13  ;;  %v92_v24 = vld [vmem:[#allocation2 + $0x148] sm:$0xff]  ;;  %v93_v25 = vld [vmem:[#allocation2 + $0x150] sm:$0xff]  ;;  %v191_v28 = vadd.f32 %v190_v15, %v90_v19 }
  0x22   :  { %v94_v26 = vld [vmem:[#allocation2 + $0x158] sm:$0xff]  ;;  %v178_v27 = vadd.f32 %v177_v14, %v89_v17  ;;  %v204_v29 = vadd.f32 %v203_v16, %v91_v20  ;;  %v95_v30 = vld [vmem:[#allocation2 + $0x160] sm:$0xff]  ;;  %v96_v31 = vld [vmem:[#allocation2 + $0x168] sm:$0xff]  ;;  %v217_v35 = vadd.f32 %v216_v23, %v92_v24 }
  0x23   :  { %v97_v32 = vld [vmem:[#allocation2 + $0x170] sm:$0xff]  ;;  %v153_v33 = vadd.f32 %v152_v21, %v93_v25  ;;  %v166_v34 = vadd.f32 %v165_v22, %v94_v26  ;;  %v98_v38 = vld [vmem:[#allocation2 + $0x178] sm:$0xff]  ;;  %v192_v40 = vadd.f32 %v191_v28, %v96_v31  ;;  %v1316_v42 = vld [vmem:[%s1784_s1] sm:$0x77] }
  0x24   :  { %v179_v39 = vadd.f32 %v178_v27, %v95_v30  ;;  %v205_v41 = vadd.f32 %v204_v29, %v97_v32  ;;  %v1321_v43 = vld [vmem:[%s1784_s1 + $0x8] sm:$0x77]  ;;  %v218_v49 = vadd.f32 %v217_v35, %v98_v38  ;;  %v1327_v50 = vld [vmem:[%s1784_s1 + $0x10] sm:$0x77]  ;;  %v1331_v51 = vcombine.high %v1316_v42, %v1316_v42  ;;  %v1336_v52 = vld [vmem:[%s1789_s6 + $0x1] sm:$0x1] }
  0x25   :  { %1130 = vset.pattern.permute.xlu1 %v1189_v46  ;;  %v154_v47 = vrot.slane %v153_v33, 4  ;;  %v167_v48 = vrot.slane %v166_v34, 4  ;;  %v193_v54 = vrot.slane %v192_v40, 4  ;;  %v1341_v56 = vcombine.high %v1321_v43, %v1321_v43  ;;  %v99_v57 = vld [vmem:[#allocation2 + $0x180] sm:$0xff]  ;;  %v105_v5 = vld [vmem:[#allocation2 + $0x1b0] sm:$0xff]  ;;  %v100_v9 = vld [vmem:[#allocation2 + $0x188] sm:$0xff] }
  0x26   :  { %506 = vperm.xlu1 %1130, %v1290_v3   ;;  %v180_v53 = vrot.slane %v179_v39, 4  ;;  %v206_v55 = vrot.slane %v205_v41, 4  ;;  %v219_v60 = vrot.slane %v218_v49, 4  ;;  %v1345_v61 = vcombine.high %v1327_v50, %v1327_v50  ;;  %v106_v10 = vld [vmem:[#allocation2 + $0x1b8] sm:$0xff]  ;;  %v111_v16 = vld [vmem:[#allocation2 + $0x1e0] sm:$0xff]  ;;  %v112_v21 = vld [vmem:[#allocation2 + $0x1e8] sm:$0xff] }
  0x27   :  { %v155_v58 = vadd.f32 %v154_v47, %v153_v33  ;;  %v168_v59 = vadd.f32 %v167_v48, %v166_v34  ;;  %v194_v63 = vadd.f32 %v193_v54, %v192_v40  ;;  %v539_v3 = vrot.slane %v1336_v52, %v1304_v45  ;;  %v117_v26 = vld [vmem:[#allocation2 + $0x210] sm:$0xff]  ;;  %v118_v31 = vld [vmem:[#allocation2 + $0x218] sm:$0xff]  ;;  %s1190_s1 = smov 127   ;;  %v123_v35 = vld [vmem:[#allocation2 + $0x240] sm:$0xff] }
  0x28   :  { %v181_v62 = vadd.f32 %v180_v53, %v179_v39  ;;  %v207_v1 = vadd.f32 %v206_v55, %v205_v41  ;;  %v220_v8 = vadd.f32 %v219_v60, %v218_v49  ;;  %v225_v11 = vadd.f32 %v105_v5, %v99_v57  ;;  %v124_v47 = vld [vmem:[#allocation2 + $0x248] sm:$0xff]  ;;  %v129_v55 = vld [vmem:[#allocation2 + $0x270] sm:$0xff] }
  0x29   :  { %v156_v6 = vrot.slane %v155_v58, 2  ;;  %v169_v7 = vrot.slane %v168_v59, 2  ;;  %v195_v13 = vrot.slane %v194_v63, 2  ;;  %v1351_v15 = vmul.f32 %v539_v3, %v1285_v2 }
  0x2a   :  { %510 = vperm.xlu1 %1130, %v1285_v2   ;;  %v182_v12 = vrot.slane %v181_v62, 2  ;;  %v208_v14 = vrot.slane %v207_v1, 2  ;;  %v221_v20 = vrot.slane %v220_v8, 2  ;;  %v226_v22 = vadd.f32 %v225_v11, %v111_v16 }
  0x2b   :  { %v157_v17 = vadd.f32 %v156_v6, %v155_v58  ;;  %v170_v19 = vadd.f32 %v169_v7, %v168_v59  ;;  %v196_v24 = vadd.f32 %v195_v13, %v194_v63  ;;  %v238_v27 = vadd.f32 %v106_v10, %v100_v9  ;;  %v101_v6 = vld [vmem:[#allocation2 + $0x190] sm:$0xff]  ;;  %v135_v7 = vld [vmem:[#allocation2 + $0x2a0] sm:$0xff] }
  0x2c   :  { %v183_v23 = vadd.f32 %v182_v12, %v181_v62  ;;  %v209_v25 = vadd.f32 %v208_v14, %v207_v1  ;;  %v222_v30 = vadd.f32 %v221_v20, %v220_v8  ;;  %v227_v32 = vadd.f32 %v226_v22, %v117_v26  ;;  %v130_v62 = vld [vmem:[#allocation2 + $0x278] sm:$0xff]  ;;  %v103_v13 = vld [vmem:[#allocation2 + $0x1a0] sm:$0xff]  ;;  %v104_v14 = vld [vmem:[#allocation2 + $0x1a8] sm:$0xff] }
  0x2d   :  { %v158_v28 = vrot.slane %v157_v17, 1  ;;  %v171_v29 = vrot.slane %v170_v19, 1  ;;  %v197_v33 = vrot.slane %v196_v24, 1  ;;  %v239_v38 = vadd.f32 %v238_v27, %v112_v21  ;;  %v102_v12 = vld [vmem:[#allocation2 + $0x198] sm:$0xff]  ;;  %v107_v20 = vld [vmem:[#allocation2 + $0x1c0] sm:$0xff]  ;;  %v136_v21 = vld [vmem:[#allocation2 + $0x2a8] sm:$0xff] }
  0x2e   :  { %546 = vrot.lane.b32.xlu1 %v1311_v36, %s1190_s1  ;;  %v184_v2 = vrot.slane %v183_v23, 1  ;;  %v210_v34 = vrot.slane %v209_v25, 1  ;;  %v223_v41 = vrot.slane %v222_v30, 1  ;;  %v228_v48 = vadd.f32 %v227_v32, %v123_v35  ;;  %v141_v22 = vld [vmem:[#allocation2 + $0x2d0] sm:$0xff]  ;;  %v108_v27 = vld [vmem:[#allocation2 + $0x1c8] sm:$0xff] }
  0x2f   :  { %v159_v39 = vadd.f32 %v158_v28, %v157_v17  ;;  %v172_v40 = vadd.f32 %v171_v29, %v170_v19  ;;  %1131 = vset.pattern.permute.xlu1 %v1187_v0  ;;  %v198_v53 = vadd.f32 %v197_v33, %v196_v24  ;;  %v240_v57 = vadd.f32 %v239_v38, %v118_v31  ;;  %v109_v28 = vld [vmem:[#allocation2 + $0x1d0] sm:$0xff]  ;;  %v110_v29 = vld [vmem:[#allocation2 + $0x1d8] sm:$0xff] }
  0x30   :  { %v185_v49 = vadd.f32 %v184_v2, %v183_v23  ;;  %v211_v54 = vadd.f32 %v210_v34, %v209_v25  ;;  %v224_v58 = vadd.f32 %v223_v41, %v222_v30  ;;  %v229_v63 = vadd.f32 %v228_v48, %v129_v55  ;;  %v113_v33 = vld [vmem:[#allocation2 + $0x1f0] sm:$0xff]  ;;  %v142_v34 = vld [vmem:[#allocation2 + $0x2d8] sm:$0xff] }
  0x31   :  { %v304_v59 = vmul.f32 0.015625, %v159_v39  ;;  %v305_v60 = vmul.f32 0.015625, %v172_v40  ;;  %v307_v3 = vmul.f32 0.015625, %v198_v53  ;;  %v241_v8 = vadd.f32 %v240_v57, %v124_v47  ;;  %v114_v38 = vld [vmem:[#allocation2 + $0x1f8] sm:$0xff]  ;;  %v115_v39 = vld [vmem:[#allocation2 + $0x200] sm:$0xff]  ;;  %v116_v40 = vld [vmem:[#allocation2 + $0x208] sm:$0xff] }
  0x32   :  { %v306_v1 = vmul.f32 0.015625, %v185_v49  ;;  %v308_v5 = vmul.f32 0.015625, %v211_v54  ;;  %548 = vrot.lane.b32.xlu1 %v1351_v15, %s1190_s1  ;;  %v309_v9 = vmul.f32 0.015625, %v224_v58  ;;  %v230_v16 = vadd.f32 %v229_v63, %v135_v7  ;;  %v119_v53 = vld [vmem:[#allocation2 + $0x220] sm:$0xff]  ;;  %v125_v7 = vld [vmem:[#allocation2 + $0x250] sm:$0xff] }
  0x33   :  { %v329_v10 = vmul.f32 %v1316_v42, %v304_v59  ;;  %v330_v11 = vmul.f32 %v1331_v51, %v305_v60  ;;  %v332_v19 = vmul.f32 %v1341_v56, %v307_v3  ;;  %v242_v23 = vadd.f32 %v241_v8, %v130_v62  ;;  %v120_v59 = vld [vmem:[#allocation2 + $0x228] sm:$0xff]  ;;  %v121_v60 = vld [vmem:[#allocation2 + $0x230] sm:$0xff]  ;;  %v122_v62 = vld [vmem:[#allocation2 + $0x238] sm:$0xff] }
  0x34   :  { %v331_v17 = vmul.f32 %v1321_v43, %v306_v1  ;;  %v333_v24 = vmul.f32 %v1327_v50, %v308_v5  ;;  %v231_v30 = vadd.f32 %v230_v16, %v141_v22  ;;  %v334_v31 = vmul.f32 %v1345_v61, %v309_v9  ;;  %v126_v8 = vld [vmem:[#allocation2 + $0x258] sm:$0xff]  ;;  %v127_v9 = vld [vmem:[#allocation2 + $0x260] sm:$0xff] }
  0x35   :  { %v342_v25 = vsel %vm341_vm0, %v329_v10, 0.0  ;;  %v343_v26 = vsel %vm341_vm0, %v330_v11, 0.0  ;;  %v347_v35 = vsel %vm341_vm0, %v332_v19, 0.0  ;;  %v243_v47 = vadd.f32 %v242_v23, %v136_v21  ;;  %v1377_v19 = vld [vmem:[%s1790_s7] sm:$0x1] }
  0x36   :  { %v344_v32 = vadd.f32 %v343_v26, %v342_v25  ;;  %v345_v2 = vsel %vm341_vm0, %v331_v17, 0.0  ;;  %554 = vrot.lane.b32.xlu1 %v1311_v36, %s1191_s18  ;;  %v232_v41 = vrot.slane %v231_v30, 4  ;;  %v251_v48 = vadd.f32 %v107_v20, %v101_v6  ;;  %v131_v21 = vld [vmem:[#allocation2 + $0x280] sm:$0xff]  ;;  %v132_v25 = vld [vmem:[#allocation2 + $0x288] sm:$0xff]  ;;  %v133_v26 = vld [vmem:[#allocation2 + $0x290] sm:$0xff] }
  0x37   :  { %v264_v54 = vadd.f32 %v108_v27, %v102_v12  ;;  %v277_v55 = vadd.f32 %v109_v28, %v103_v13  ;;  %v290_v57 = vadd.f32 %v110_v29, %v104_v14  ;;  %v349_v58 = vsel %vm341_vm0, %v333_v24, 0.0  ;;  %v128_v13 = vld [vmem:[#allocation2 + $0x268] sm:$0xff]  ;;  %v134_v27 = vld [vmem:[#allocation2 + $0x298] sm:$0xff] }
  0x38   :  { %v346_v49 = vadd.f32 %v345_v2, %v344_v32  ;;  %v233_v63 = vadd.f32 %v232_v41, %v231_v30  ;;  %v244_v1 = vadd.f32 %v243_v47, %v142_v34  ;;  %v252_v3 = vadd.f32 %v251_v48, %v113_v33  ;;  %v137_v32 = vld [vmem:[#allocation2 + $0x2b0] sm:$0xff]  ;;  %v138_v2 = vld [vmem:[#allocation2 + $0x2b8] sm:$0xff]  ;;  %v1384_v48 = vld [vmem:[%s1790_s7 + $0x1] sm:$0x1]  ;;  %s1192_s7 = smov 1  }
  0x39   :  { %v265_v10 = vadd.f32 %v264_v54, %v114_v38  ;;  %v278_v11 = vadd.f32 %v277_v55, %v115_v39  ;;  %v291_v6 = vadd.f32 %v290_v57, %v116_v40  ;;  %v351_v12 = vsel %vm341_vm0, %v334_v31, 0.0  ;;  %v139_v38 = vld [vmem:[#allocation2 + $0x2c0] sm:$0xff]  ;;  %v140_v39 = vld [vmem:[#allocation2 + $0x2c8] sm:$0xff] }
  0x3a   :  { %v348_v5 = vadd.f32 %v347_v35, %v346_v49  ;;  %556 = vrot.lane.b32.xlu1 %v1351_v15, %s1191_s18  ;;  %v234_v14 = vrot.slane %v233_v63, 2  ;;  %v245_v16 = vrot.slane %v244_v1, 4  ;;  %v253_v17 = vadd.f32 %v252_v3, %v119_v53  ;;  %v143_v49 = vld [vmem:[#allocation2 + $0x2e0] sm:$0xff]  ;;  %v144_v57 = vld [vmem:[#allocation2 + $0x2e8] sm:$0xff] }
  0x3b   :  { %v266_v22 = vadd.f32 %v265_v10, %v120_v59  ;;  %v279_v23 = vadd.f32 %v278_v11, %v121_v60  ;;  %v292_v24 = vadd.f32 %v291_v6, %v122_v62  ;;  %v146_v59 = vld [vmem:[#allocation2 + $0x2f8] sm:$0xff] }
  0x3c   :  { %v350_v20 = vadd.f32 %v349_v58, %v348_v5  ;;  %v235_v28 = vadd.f32 %v234_v14, %v233_v63  ;;  %v246_v29 = vadd.f32 %v245_v16, %v244_v1  ;;  %v254_v30 = vadd.f32 %v253_v17, %v125_v7  ;;  %v145_v58 = vld [vmem:[#allocation2 + $0x2f0] sm:$0xff] }
  0x3d   :  { %v267_v33 = vadd.f32 %v266_v22, %v126_v8  ;;  %v280_v34 = vadd.f32 %v279_v23, %v127_v9  ;;  %v293_v35 = vadd.f32 %v292_v24, %v128_v13  ;;  %v1387_v5 = vmul.f32 2.0, %v1377_v19 }
  0x3e   :  { %v352_v31 = vadd.f32 %v351_v12, %v350_v20  ;;  %581 = vrot.lane.b32.xlu1 %v1377_v19, %s1190_s1  ;;  %v236_v40 = vrot.slane %v235_v28, 1  ;;  %v247_v41 = vrot.slane %v246_v29, 2  ;;  %v255_v47 = vadd.f32 %v254_v30, %v131_v21 }
  0x3f   :  { %v268_v53 = vadd.f32 %v267_v33, %v132_v25  ;;  %v281_v54 = vadd.f32 %v280_v34, %v133_v26  ;;  %v294_v55 = vadd.f32 %v293_v35, %v134_v27  ;;  %v575_v20 = vmul.f32 %v1387_v5, %v1377_v19 }
  0x40   :  { %353 = vadd.xlane.f32.xlu0 %v352_v31  ;;  %v248_v60 = vadd.f32 %v247_v41, %v246_v29  ;;  %v256_v62 = vadd.f32 %v255_v47, %v137_v32  ;;  %v237_v7 = vadd.f32 %v236_v40, %v235_v28  ;;  %v1402_v40 = vmul.f32 2.0, %v1384_v48 }
  0x41   :  { %v269_v63 = vadd.f32 %v268_v53, %v138_v2  ;;  %v282_v1 = vadd.f32 %v281_v54, %v139_v38  ;;  %v295_v3 = vadd.f32 %v294_v55, %v140_v39  ;;  %v1397_v31 = vsub.f32 1.0, %v575_v20 }
  0x42   :  { %583 = vrot.lane.b32.xlu1 %v1384_v48, %s1190_s1  ;;  %v249_v8 = vrot.slane %v248_v60, 1  ;;  %v257_v9 = vadd.f32 %v256_v62, %v143_v49  ;;  %v310_v22 = vmul.f32 0.015625, %v237_v7  ;;  %v1453_v20 = vsub.s32 1, %v1295_v18 }
  0x43   :  { %v270_v10 = vadd.f32 %v269_v63, %v144_v57  ;;  %v283_v11 = vadd.f32 %v282_v1, %v145_v58  ;;  %v296_v6 = vadd.f32 %v295_v3, %v146_v59  ;;  %v626_v53 = vrot.slane %v1397_v31, %v1304_v45 }
  0x44   :  { %v250_v12 = vadd.f32 %v249_v8, %v248_v60  ;;  %v258_v13 = vrot.slane %v257_v9, 4  ;;  %v335_v2 = vmul.f32 %v1316_v42, %v310_v22  ;;  %v576_v60 = vmul.f32 %v1402_v40, %v1384_v48 }
  0x45   :  { %v271_v14 = vrot.slane %v270_v10, 4  ;;  %v284_v16 = vrot.slane %v283_v11, 4  ;;  %v297_v17 = vrot.slane %v296_v6, 4 }
  0x46   :  { %591 = vrot.lane.b32.xlu1 %v1377_v19, %s1191_s18  ;;  %v259_v21 = vadd.f32 %v258_v13, %v257_v9  ;;  %v311_v23 = vmul.f32 0.015625, %v250_v12 }
  0x47   :  { %v272_v24 = vadd.f32 %v271_v14, %v270_v10  ;;  %v285_v25 = vadd.f32 %v284_v16, %v283_v11  ;;  %v298_v26 = vadd.f32 %v297_v17, %v296_v6  ;;  %v1417_v11 = vsub.f32 1.0, %v576_v60  ;;  %v461_v17 = vld [vmem:[%s1788_s5] sm:$0x7] }
  0x48   :  { %v260_v27 = vrot.slane %v259_v21, 2  ;;  %v336_v33 = vmul.f32 %v1331_v51, %v311_v23  ;;  %v355_v51 = vsel %vm341_vm0, %v335_v2, 0.0  ;;  %v1458_v23 = vsub.s32 2, %v1295_v18 }
  0x49   :  { %v273_v28 = vrot.slane %v272_v24, 2  ;;  %v286_v29 = vrot.slane %v285_v25, 2  ;;  %v299_v30 = vrot.slane %v298_v26, 2 }
  0x4a   :  { %601 = vrot.lane.b32.xlu1 %v1377_v19, %s1192_s7  ;;  %v261_v32 = vadd.f32 %v260_v27, %v259_v21  ;;  %v356_v54 = vsel %vm341_vm0, %v336_v33, 0.0  ;;  %v478_v21 = vrot.slane %v461_v17, %v1304_v45 }
  0x4b   :  { %v274_v34 = vadd.f32 %v273_v28, %v272_v24  ;;  %v287_v35 = vadd.f32 %v286_v29, %v285_v25  ;;  %v300_v38 = vadd.f32 %v299_v30, %v298_v26  ;;  %v357_v3 = vadd.f32 %v356_v54, %v355_v51  ;;  %v462_v26 = vld [vmem:[%s1788_s5 + $0x4] sm:$0x7] }
  0x4c   :  { %v262_v39 = vrot.slane %v261_v32, 1  ;;  %v500_v27 = vrot.slane %v462_v26, %v1453_v20  ;;  %v516_v28 = vrot.slane %v461_v17, %v1458_v23  ;;  %v482_v30 = vrot.slane %v462_v26, %v1304_v45 }
  0x4d   :  { %v275_v41 = vrot.slane %v274_v34, 1  ;;  %v288_v47 = vrot.slane %v287_v35, 1  ;;  %v301_v49 = vrot.slane %v300_v38, 1 }
  0x4e   :  { %611 = vrot.lane.b32.xlu1 %v1377_v19, %s1193_s23  ;;  %v263_v42 = vadd.f32 %v262_v39, %v261_v32 }
  0x4f   :  { %v276_v55 = vadd.f32 %v275_v41, %v274_v34  ;;  %v289_v57 = vadd.f32 %v288_v47, %v287_v35  ;;  %v302_v58 = vadd.f32 %v301_v49, %v300_v38  ;;  %v520_v35 = vrot.slane %v462_v26, %v1458_v23 }
  0x50   :  { %v312_v59 = vmul.f32 0.015625, %v263_v42 }
  0x51   :  { %v313_v62 = vmul.f32 0.015625, %v276_v55  ;;  %v314_v63 = vmul.f32 0.015625, %v289_v57  ;;  %v315_v1 = vmul.f32 0.015625, %v302_v58  ;;  %v562_v58 = vld [vmem:[%s1787_s4] sm:$0xff] }
  0x52   :  { %632 = vperm.xlu1 %1131, %v626_v53   ;;  %v337_v19 = vmul.f32 %v1321_v43, %v312_v59 }
  0x53   :  { %v338_v7 = vmul.f32 %v1341_v56, %v313_v62  ;;  %v339_v8 = vmul.f32 %v1327_v50, %v314_v63  ;;  %v340_v9 = vmul.f32 %v1345_v61, %v315_v1  ;;  %v1425_v50 = vrot.slane %v1417_v11, %v1304_v45  ;;  %v563_v1 = vld [vmem:[%s1787_s4 + $0x8] sm:$0xff] }
  0x54   :  { %v358_v10 = vsel %vm341_vm0, %v337_v19, 0.0 }
  0x55   :  { %v359_v6 = vadd.f32 %v358_v10, %v357_v3  ;;  %v360_v12 = vsel %vm341_vm0, %v338_v7, 0.0  ;;  %v362_v13 = vsel %vm341_vm0, %v339_v8, 0.0  ;;  %v364_v43 = vsel %vm341_vm0, %v340_v9, 0.0 }
  0x56   :  { %1132 = vset.pattern.permute.xlu1 %v1188_v44 }
  0x57   :  { %716 = vperm.xlu1 %1132, %v626_v53   ;;  %v361_v14 = vadd.f32 %v360_v12, %v359_v6 }
  0x59   :  { %v363_v56 = vadd.f32 %v362_v13, %v361_v14 }
  0x5b   :  { %720 = vperm.xlu1 %1132, %v1425_v50   ;;  %v365_v61 = vadd.f32 %v364_v43, %v363_v56 }
  0x5d   :  { %366 = vadd.xlane.f32.xlu0 %v365_v61 }
  0x5f   :  { %1133 = vset.pattern.permute.xlu1 %v1189_v46 }
  0x60   :  { %780 = vperm.xlu1 %1133, %v626_v53  }
  0x64   :  { %1134 = vset.pattern.permute.xlu1 %v1187_v0 }
  0x65   :  { %796 = vperm.xlu1 %1134, %v1300_v37  }
  0x69   :  { %1135 = vset.pattern.permute.xlu1 %v1188_v44 }
  0x6a   :  { %814 = vperm.xlu1 %1135, %v1300_v37  }
  0x6e   :  { %822 = vperm.xlu1 %1135, %v1336_v52  }
  0x72   :  { %1136 = vset.pattern.permute.xlu1 %v1189_v46 }
  0x73   :  { %840 = vperm.xlu1 %1136, %v1336_v52   ;;  %593 = vrot.lane.b32.xlu0 %v1384_v48, %s1191_s18 }
  0x77   :  { %1137 = vset.pattern.permute.xlu1 %v1188_v44  ;;  %603 = vrot.lane.b32.xlu0 %v1384_v48, %s1192_s7 }
  0x78   :  { %942 = vperm.xlu1 %1137, %v1397_v31  }
  0x7b   :  { %613 = vrot.lane.b32.xlu0 %v1384_v48, %s1193_s23  ;;  %v496_v48 = vrot.slane %v461_v17, %v1453_v20 }
  0x7c   :  { %950 = vperm.xlu1 %1137, %v1417_v11  }
  0x7f   :  { %636 = vperm.xlu0 %1128, %v1425_v50  }
  0x83   :  { %804 = vperm.xlu0 %1128, %v1336_v52  }
  0x86   :  { %v1447_v37 = vpop.permute.xlu1 %373 }
  0x93   :  { %v473_v32 = vpop.permute.xlu0 %472 }
  0x94   :  { %v484_v38 = vmul.f32 %v482_v30, %v473_v32 }
  0x97   :  { %v468_v16 = vpop.permute.xlu1 %467 }
  0x98   :  { %v483_v24 = vmul.f32 %v478_v21, %v468_v16 }
  0x9c   :  { %v487_v22 = vpop.permute.xlu1 %486 }
  0x9d   :  { %v501_v52 = vmul.f32 %v496_v48, %v487_v22 }
  0x9f   :  { %v503_v29 = vadd.f32 %v501_v52, %v483_v24 }
  0xa0   :  { %v491_v25 = vpop.permute.xlu1 %490 }
  0xa1   :  { %v502_v33 = vmul.f32 %v500_v27, %v491_v25  ;;  %v1516_v27 = vand.u32 127, %v391_v4 }
  0xa3   :  { %v504_v47 = vadd.f32 %v502_v33, %v484_v38  ;;  %vm411_vm3 = vcmp.eq.s32.totalorder %v1516_v27, 1  ;;  %vm419_vm5 = vcmp.eq.s32.totalorder %v1516_v27, 2  ;;  %vm396_vm6 = vcmp.eq.s32.totalorder %v1516_v27, 0 }
  0xa4   :  { %vm412_vm8 = vmand %vm410_vm7, %vm411_vm3 }
  0xa5   :  { %v507_v2 = vpop.permute.xlu1 %506  ;;  %vm420_vm9 = vmand %vm395_vm4, %vm419_vm5 }
  0xa6   :  { %v521_v34 = vmul.f32 %v516_v28, %v507_v2  ;;  %vm397_vm10 = vmand %vm395_vm4, %vm396_vm6 }
  0xa7   :  { %vm435_vm11 = vmand %vm410_vm7, %vm419_vm5 }
  0xa8   :  { %v523_v39 = vadd.f32 %v521_v34, %v503_v29  ;;  %v1194_v34 = vmov 0.0   ;;  %vm451_vm13 = vmand %vm450_vm12, %vm419_vm5 }
  0xa9   :  { %v511_v41 = vpop.permute.xlu1 %510  ;;  %vm643_vm15 = vmand %vm395_vm4, %vm411_vm3  ;;  %vm1080_vm4 = vcmask 1041408  }
  0xaa   :  { %v525_v49 = vsub.f32 1.0, %v523_v39  ;;  %v522_v53 = vmul.f32 %v520_v35, %v511_v41  ;;  %v1538_v35 = vsel %vm412_vm8, 1.0, %v1194_v34  ;;  %vm690_vm0 = vmand %vm410_vm7, %vm396_vm6 }
  0xac   :  { %528 = vst.msk [vmem:[%s1793_s10] sm:$0xff] %vm527_vm1, %v525_v49  ;;  %v524_v42 = vadd.f32 %v522_v53, %v504_v47  ;;  %v1548_v47 = vsel %vm397_vm10, 1.0, %v1194_v34  ;;  %v1552_v53 = vsel %vm420_vm9, 1.0, %v1194_v34 }
  0xad   :  { %v547_v51 = vpop.permute.xlu1 %546 }
  0xae   :  { %v526_v54 = vsub.f32 1.0, %v524_v42  ;;  %v552_v57 = vadd.f32 %v547_v51, %v1311_v36 }
  0xb0   :  { %529 = vst.msk [vmem:[%s1793_s10 + $0x8] sm:$0xff] %vm527_vm1, %v526_v54  ;;  %vm739_vm1 = vmand %vm450_vm12, %vm396_vm6 }
  0xb1   :  { %v549_v55 = vpop.permute.xlu1 %548 }
  0xb2   :  { %v553_v60 = vadd.f32 %v549_v55, %v1351_v15  ;;  %v1558_v55 = vsel %vm435_vm11, 1.0, %v1194_v34 }
  0xb5   :  { %v555_v59 = vpop.permute.xlu1 %554 }
  0xb6   :  { %v560_v62 = vadd.f32 %v555_v59, %v552_v57 }
  0xb8   :  { %v564_v63 = vadd.f32 %v562_v58, %v560_v62 }
  0xb9   :  { %v557_v3 = vpop.permute.xlu1 %556 }
  0xba   :  { %v566_v19 = vmul.f32 %v564_v63, %v564_v63  ;;  %v561_v7 = vadd.f32 %v557_v3, %v553_v60 }
  0xbc   :  { %569 = vst.msk [vmem:[%s1794_s11] sm:$0xff] %vm568_vm2, %v566_v19  ;;  %v565_v36 = vadd.f32 %v563_v1, %v561_v7  ;;  %v1576_v7 = vsel %vm451_vm13, 1.0, %v1194_v34 }
  0xbd   :  { %v1484_v8 = vpop.permute.xlu1 %581 }
  0xbe   :  { %v567_v9 = vmul.f32 %v565_v36, %v565_v36 }
  0xc0   :  { %570 = vst.msk [vmem:[%s1794_s11 + $0x8] sm:$0xff] %vm568_vm2, %v567_v9  ;;  %vm764_vm2 = vmand %vm450_vm12, %vm411_vm3  ;;  %vm1077_vm3 = vcmask 1040384  }
  0xc1   :  { %v584_v15 = vpop.permute.xlu1 %583 }
  0xc2   :  { %v588_v10 = vmul.f32 %v584_v15, %v1402_v40 }
  0xc4   :  { %v1490_v6 = vsub.f32 0.0, %v588_v10  ;;  %v1585_v10 = vld [vmem:[%s1791_s8] sm:$0x7] }
  0xc5   :  { %v1492_v12 = vpop.permute.xlu1 %591 }
  0xc6   :  { %v1496_v13 = vrot.slane %v1490_v6, %v1304_v45 }
  0xc8   :  { %661 = vperm.xlu0 %1128, %v1496_v13  }
  0xc9   :  { %v602_v14 = vpop.permute.xlu1 %601 }
  0xca   :  { %v607_v43 = vmul.f32 %v602_v14, %v1387_v5 }
  0xcc   :  { %v1500_v56 = vsub.f32 0.0, %v607_v43 }
  0xcd   :  { %v354_v61 = vpop.xlane.xlu0 %353  ;;  %v1502_v16 = vpop.permute.xlu1 %611 }
  0xce   :  { %v375_v17 = vadd.f32 %v1447_v37, %v354_v61  ;;  %922 = vperm.xlu1 %1137, %v1500_v56  }
  0xd0   :  { %1151 = vtanh.f32 %v375_v17  ;;  %v587_v17 = vmul.f32 %v1484_v8, %v1387_v5 }
  0xd1   :  { %v1506_v21 = vpop.permute.xlu1 %632 }
  0xd2   :  { %1138 = vset.pattern.permute.xlu1 %v1189_v46 }
  0xd6   :  { %v1509_v48 = vpop.permute.xlu1 %716 }
  0xda   :  { %v1152_v22 = vpop.eup %1151  ;;  %v1511_v24 = vpop.permute.xlu1 %720 }
  0xdb   :  { %v379_v52 = vmul.f32 1.3862944, %v1152_v22  ;;  %v387_v28 = vmul.f32 32.0, %v1152_v22 }
  0xdd   :  { %v381_v25 = vmul.f32 1.442695, %v379_v52  ;;  %v389_v4 = vadd.f32 32.0, %v387_v28 }
  0xdf   :  { %1153 = vpow2.f32 %v381_v25  ;;  %v1513_v26 = vpop.permute.xlu1 %780  ;;  %v426_v41 = vrot.slane %v389_v4, %v1453_v20  ;;  %v441_v51 = vrot.slane %v389_v4, %v1458_v23 }
  0xe1   :  { %v431_v59 = vmul.f32 %v1552_v53, %v426_v41  ;;  %v446_v3 = vmul.f32 %v1558_v55, %v441_v51 }
  0xe4   :  { %v1518_v29 = vpop.permute.xlu1 %796 }
  0xe9   :  { %v1154_v30 = vpop.eup %1153  ;;  %v815_v32 = vpop.permute.xlu1 %814 }
  0xea   :  { %v385_v2 = vmul.f32 88.8, %v1154_v30  ;;  %v367_v33 = vpop.xlane.xlu0 %366  ;;  %v1570_v62 = vrot.slane %v815_v32, %v1304_v45 }
  0xeb   :  { %v376_v38 = vadd.f32 %v1447_v37, %v367_v33 }
  0xec   :  { %v403_v39 = vrot.slane %v385_v2, %v1304_v45  ;;  %v1589_v14 = vsub.f32 %v1585_v10, %v1570_v62  ;;  %v1606_v2 = vld [vmem:[%s1791_s8 + $0x4] sm:$0x7] }
  0xed   :  { %v823_v49 = vpop.permute.xlu1 %822  ;;  %1155 = vtanh.f32 %v376_v38  ;;  %v589_v38 = vsub.f32 0.0, %v587_v17 }
  0xee   :  { %v408_v37 = vmul.f32 %v1548_v47, %v403_v39  ;;  %v415_v42 = vmul.f32 %v1538_v35, %v403_v39  ;;  %v594_v54 = vpop.permute.xlu0 %593  ;;  %v1592_v43 = vrot.slane %v823_v49, %v1304_v45  ;;  %v1618_v39 = vmul.f32 %v1492_v12, %v1387_v5 }
  0xef   :  { %v1561_v57 = vmul.f32 %v594_v54, %v1402_v40 }
  0xf0   :  { %v417_v58 = vadd.f32 %v415_v42, %v408_v37  ;;  %v599_v54 = vsub.f32 0.0, %v1618_v39 }
  0xf1   :  { %v600_v60 = vsub.f32 0.0, %v1561_v57 }
  0xf2   :  { %v1572_v63 = vpop.permute.xlu1 %840  ;;  %v433_v1 = vadd.f32 %v431_v59, %v417_v58  ;;  %v604_v19 = vpop.permute.xlu0 %603  ;;  %v651_v58 = vrot.slane %v589_v38, %v1304_v45  ;;  %v673_v59 = vrot.slane %v599_v54, %v1304_v45 }
  0xf3   :  { %v677_v36 = vrot.slane %v600_v60, %v1304_v45  ;;  %v608_v15 = vmul.f32 %v604_v19, %v1402_v40 }
  0xf4   :  { %v448_v9 = vadd.f32 %v446_v3, %v433_v1  ;;  %v617_v1 = vmul.f32 %v1502_v16, %v1387_v5 }
  0xf5   :  { %683 = vperm.xlu0 %1128, %v677_v36   ;;  %v610_v32 = vsub.f32 0.0, %v608_v15  ;;  %v698_v15 = vrot.slane %v1500_v56, %v1304_v45 }
  0xf6   :  { %v454_v61 = vadd.f32 %v1576_v7, %v448_v9  ;;  %v614_v22 = vpop.permute.xlu0 %613  ;;  %v619_v9 = vsub.f32 0.0, %v617_v1  ;;  %v724_v1 = vmul.f32 %v1538_v35, %v1511_v24 }
  0xf7   :  { %v943_v52 = vpop.permute.xlu1 %942  ;;  %v1156_v25 = vpop.eup %1155  ;;  %v618_v28 = vmul.f32 %v614_v22, %v1402_v40  ;;  %v1611_v40 = vsub.f32 %v1606_v2, %v1592_v43  ;;  %v702_v42 = vrot.slane %v610_v32, %v1304_v45 }
  0xf8   :  { %v948_v4 = vrot.slane %v943_v52, %v1304_v45  ;;  %457 = vst.msk [vmem:[%s1792_s9] sm:$0x7] %vm456_vm14, %v454_v61  ;;  %v380_v30 = vmul.f32 1.3862944, %v1156_v25  ;;  %v388_v12 = vmul.f32 32.0, %v1156_v25  ;;  %v747_v5 = vrot.slane %v619_v9, %v1304_v45 }
  0xf9   :  { %v620_v8 = vsub.f32 0.0, %v618_v28  ;;  %858 = vperm.xlu0 %1128, %v1417_v11  }
  0xfa   :  { %v1614_v33 = vmul.f32 %v948_v4, %v1589_v14  ;;  %v383_v41 = vmul.f32 1.442695, %v380_v30  ;;  %v390_v3 = vadd.f32 32.0, %v388_v12 }
  0xfb   :  { %v951_v49 = vpop.permute.xlu1 %950  ;;  %1002 = vperm.xlu1 %1138, %v620_v8   ;;  %v751_v30 = vrot.slane %v620_v8, %v1304_v45  ;;  %v1112_v8 = vsel %vm643_vm15, 1.0, %v1194_v34 }
  0xfc   :  { %v956_v37 = vrot.slane %v951_v49, %v1304_v45  ;;  %1157 = vpow2.f32 %v383_v41  ;;  %v430_v17 = vrot.slane %v390_v3, %v1453_v20  ;;  %v445_v52 = vrot.slane %v390_v3, %v1458_v23 }
  0xfd   :  { %1143 = vset.pattern.permute.xlu0 %v1188_v44 }
  0xfe   :  { %v1624_v51 = vmul.f32 %v956_v37, %v1611_v40  ;;  %708 = vperm.xlu0 %1143, %v702_v42   ;;  %v432_v28 = vmul.f32 %v1552_v53, %v430_v17  ;;  %v447_v20 = vmul.f32 %v1558_v55, %v445_v52  ;;  %v637_v57 = vpop.permute.xlu0 %636  ;;  %v1113_v37 = vsel %vm690_vm0, 1.0, %v1194_v34 }
  0xff   :  { %1139 = vset.pattern.permute.xlu1 %v1187_v0  ;;  %v639_v17 = vmul.f32 %v1548_v47, %v1506_v21 }
 0x100   :  { %657 = vperm.xlu1 %1139, %v651_v58  }
 0x102   :  { %728 = vperm.xlu0 %1143, %v651_v58  }
 0x104   :  { %679 = vperm.xlu1 %1139, %v673_v59  }
 0x106   :  { %v1158_v19 = vpop.eup %1157  ;;  %930 = vperm.xlu0 %1143, %v610_v32  }
 0x107   :  { %v386_v36 = vmul.f32 88.8, %v1158_v19 }
 0x108   :  { %1140 = vset.pattern.permute.xlu1 %v1188_v44 }
 0x109   :  { %v407_v61 = vrot.slane %v386_v36, %v1304_v45  ;;  %704 = vperm.xlu1 %1140, %v698_v15  }
 0x10a   :  { %968 = vperm.xlu0 %1143, %v589_v38  }
 0x10b   :  { %v409_v22 = vmul.f32 %v1548_v47, %v407_v61  ;;  %v416_v16 = vmul.f32 %v1538_v35, %v407_v61 }
 0x10d   :  { %732 = vperm.xlu1 %1140, %v1496_v13   ;;  %v418_v25 = vadd.f32 %v416_v16, %v409_v22  ;;  %v1159_v13 = vld [vmem:[%s1789_s6] sm:$0x1] }
 0x10e   :  { %1144 = vset.pattern.permute.xlu0 %v1189_v46 }
 0x10f   :  { %753 = vperm.xlu0 %1144, %v747_v5   ;;  %v434_v4 = vadd.f32 %v432_v28, %v418_v25 }
 0x111   :  { %1141 = vset.pattern.permute.xlu1 %v1189_v46  ;;  %v449_v39 = vadd.f32 %v447_v20, %v434_v4 }
 0x112   :  { %757 = vperm.xlu1 %1141, %v751_v30  }
 0x113   :  { %772 = vperm.xlu0 %1144, %v702_v42   ;;  %v455_v23 = vadd.f32 %v1576_v7, %v449_v39  ;;  %v962_v39 = vrot.slane %v1624_v51, 1 }
 0x115   :  { %458 = vst.msk [vmem:[%s1792_s9 + $0x4] sm:$0x7] %vm456_vm14, %v455_v23 }
 0x116   :  { %768 = vperm.xlu1 %1141, %v698_v15  }
 0x117   :  { %784 = vperm.xlu0 %1144, %v1425_v50   ;;  %v1670_v50 = vrot.slane %v1518_v29, %v1304_v45 }
 0x11a   :  { %1014 = vperm.xlu1 %1141, %v1500_v56  }
 0x11b   :  { %832 = vperm.xlu0 %1144, %v1159_v13  }
 0x11e   :  { %1142 = vset.pattern.permute.xlu1 %v1187_v0 }
 0x11f   :  { %994 = vperm.xlu0 %1144, %v619_v9   ;;  %850 = vperm.xlu1 %1142, %v1397_v31  }
 0x123   :  { %1022 = vperm.xlu0 %1144, %v610_v32   ;;  %870 = vperm.xlu1 %1142, %v589_v38  }
 0x127   :  { %1048 = vperm.xlu0 %1144, %v1417_v11   ;;  %878 = vperm.xlu1 %1142, %v1490_v6  }
 0x12b   :  { %1145 = vset.pattern.permute.xlu1 %v1188_v44  ;;  %v1674_v44 = vsub.f32 %v1585_v10, %v1670_v50 }
 0x12c   :  { %976 = vperm.xlu1 %1145, %v1490_v6  }
 0x130   :  { %1146 = vset.pattern.permute.xlu1 %v1189_v46 }
 0x131   :  { %1040 = vperm.xlu1 %1146, %v1397_v31   ;;  %v961_v31 = vrot.slane %v1614_v33, 1 }
 0x135   :  { %1147 = vset.pattern.permute.xlu1 %v1187_v0 }
 0x136   :  { %896 = vperm.xlu1 %1147, %v599_v54  }
 0x13a   :  { %904 = vperm.xlu1 %1147, %v600_v60   ;;  %v805_v60 = vpop.permute.xlu0 %804 }
 0x13b   :  { %v1701_v36 = vrot.slane %v805_v60, %v1304_v45 }
 0x13d   :  { %v1708_v16 = vsub.f32 %v1606_v2, %v1701_v36 }
 0x147   :  { %v662_v32 = vpop.permute.xlu0 %661 }
 0x148   :  { %v665_v38 = vmul.f32 %v1112_v8, %v662_v32 }
 0x14d   :  { %v923_v11 = vpop.permute.xlu1 %922 }
 0x14e   :  { %v928_v6 = vrot.slane %v923_v11, %v1304_v45 }
 0x150   :  { %v937_v46 = vmul.f32 %v928_v6, %v1674_v44  ;;  %v1115_v6 = vsel %vm764_vm2, 1.0, %v1194_v34 }
 0x152   :  { %v939_v0 = vadd.f32 %v937_v46, %v1570_v62  ;;  %v640_v62 = vmul.f32 %v1548_v47, %v637_v57  ;;  %v723_v47 = vmul.f32 %v1538_v35, %v1509_v48  ;;  %v1114_v48 = vsel %vm739_vm1, 1.0, %v1194_v34 }
 0x154   :  { %v1680_v56 = vadd.f32 %v961_v31, %v939_v0  ;;  %v667_v42 = vadd.f32 %v665_v38, %v640_v62 }
 0x174   :  { %v684_v29 = vpop.permute.xlu0 %683 }
 0x175   :  { %v687_v33 = vmul.f32 %v1552_v53, %v684_v29 }
 0x177   :  { %v689_v58 = vadd.f32 %v687_v33, %v667_v42 }
 0x178   :  { %v1687_v41 = vpop.permute.xlu0 %858 }
 0x17a   :  { %v1695_v49 = vpop.permute.xlu1 %1002 }
 0x17d   :  { %v709_v54 = vpop.permute.xlu0 %708 }
 0x17e   :  { %v712_v12 = vmul.f32 %v1113_v37, %v709_v54 }
 0x17f   :  { %v658_v59 = vpop.permute.xlu1 %657 }
 0x180   :  { %v714_v3 = vadd.f32 %v712_v12, %v689_v58  ;;  %v664_v15 = vmul.f32 %v1112_v8, %v658_v59 }
 0x181   :  { %v729_v19 = vpop.permute.xlu0 %728 }
 0x182   :  { %v726_v9 = vadd.f32 %v724_v1, %v714_v3  ;;  %v666_v52 = vadd.f32 %v664_v15, %v639_v17  ;;  %v735_v35 = vmul.f32 %v1558_v55, %v729_v19  ;;  %v846_v17 = vrot.slane %v1572_v63, %v1304_v45 }
 0x183   :  { %v680_v61 = vpop.permute.xlu1 %679 }
 0x184   :  { %v686_v22 = vmul.f32 %v1552_v53, %v680_v61  ;;  %v848_v63 = vsub.f32 %v1606_v2, %v846_v17 }
 0x185   :  { %v931_v5 = vpop.permute.xlu0 %930 }
 0x186   :  { %v936_v24 = vrot.slane %v931_v5, %v1304_v45  ;;  %v688_v4 = vadd.f32 %v686_v22, %v666_v52 }
 0x188   :  { %v938_v25 = vmul.f32 %v936_v24, %v1708_v16  ;;  %v705_v28 = vpop.permute.xlu1 %704 }
 0x189   :  { %v711_v20 = vmul.f32 %v1113_v37, %v705_v28  ;;  %v1712_v30 = vpop.permute.xlu0 %968 }
 0x18a   :  { %v940_v21 = vadd.f32 %v938_v25, %v1592_v43  ;;  %v974_v2 = vrot.slane %v1712_v30, %v1304_v45 }
 0x18b   :  { %v713_v53 = vadd.f32 %v711_v20, %v688_v4 }
 0x18c   :  { %v1718_v23 = vadd.f32 %v962_v39, %v940_v21  ;;  %v733_v13 = vpop.permute.xlu1 %732 }
 0x18d   :  { %v725_v11 = vadd.f32 %v723_v47, %v713_v53  ;;  %v736_v43 = vmul.f32 %v1558_v55, %v733_v13  ;;  %v787_v55 = vmul.f32 %v1576_v7, %v1513_v26 }
 0x18e   :  { %v754_v51 = vpop.permute.xlu0 %753 }
 0x18f   :  { %v738_v31 = vadd.f32 %v736_v43, %v726_v9  ;;  %v737_v0 = vadd.f32 %v735_v35, %v725_v11  ;;  %v760_v57 = vmul.f32 %v1114_v48, %v754_v51  ;;  %v1008_v9 = vrot.slane %v1695_v49, %v1304_v45 }
 0x191   :  { %v758_v46 = vpop.permute.xlu1 %757  ;;  %v762_v18 = vadd.f32 %v760_v57, %v737_v0  ;;  %v1010_v4 = vmul.f32 %v1008_v9, %v1708_v16 }
 0x192   :  { %v761_v60 = vmul.f32 %v1114_v48, %v758_v46  ;;  %v773_v32 = vpop.permute.xlu0 %772 }
 0x193   :  { %v776_v29 = vmul.f32 %v1115_v6, %v773_v32  ;;  %v1012_v43 = vadd.f32 %v1010_v4, %v846_v17 }
 0x194   :  { %v763_v27 = vadd.f32 %v761_v60, %v738_v31 }
 0x195   :  { %v769_v8 = vpop.permute.xlu1 %768 }
 0x196   :  { %v778_v38 = vadd.f32 %v776_v29, %v763_v27  ;;  %v775_v62 = vmul.f32 %v1115_v6, %v769_v8  ;;  %v785_v33 = vpop.permute.xlu0 %784 }
 0x197   :  { %v788_v37 = vmul.f32 %v1576_v7, %v785_v33 }
 0x198   :  { %v777_v42 = vadd.f32 %v775_v62, %v762_v18 }
 0x199   :  { %v790_v34 = vadd.f32 %v788_v37, %v778_v38  ;;  %v1015_v54 = vpop.permute.xlu1 %1014 }
 0x19a   :  { %v789_v58 = vadd.f32 %v787_v55, %v777_v42  ;;  %v833_v12 = vpop.permute.xlu0 %832  ;;  %v1020_v59 = vrot.slane %v1015_v54, %v1304_v45 }
 0x19b   :  { %792 = vst.msk [vmem:[%s1795_s12 + $0x4] sm:$0x7] %vm456_vm14, %v790_v34  ;;  %v838_v15 = vrot.slane %v833_v12, %v1304_v45 }
 0x19c   :  { %791 = vst.msk [vmem:[%s1795_s12] sm:$0x7] %vm456_vm14, %v789_v58  ;;  %v1029_v26 = vmul.f32 %v1020_v59, %v1589_v14 }
 0x19e   :  { %v851_v1 = vpop.permute.xlu1 %850  ;;  %v995_v3 = vpop.permute.xlu0 %994  ;;  %v1033_v24 = vrot.slane %v1029_v26, 1 }
 0x19f   :  { %v856_v7 = vrot.slane %v851_v1, %v1304_v45  ;;  %v1000_v19 = vrot.slane %v995_v3, %v1304_v45 }
 0x1a1   :  { %v1009_v61 = vmul.f32 %v1000_v19, %v1674_v44  ;;  %v865_v52 = vmul.f32 %v856_v7, %v1674_v44 }
 0x1a2   :  { %v871_v22 = vpop.permute.xlu1 %870  ;;  %v1023_v5 = vpop.permute.xlu0 %1022 }
 0x1a3   :  { %v1011_v25 = vadd.f32 %v1009_v61, %v838_v15  ;;  %v876_v28 = vrot.slane %v871_v22, %v1304_v45  ;;  %v1028_v20 = vrot.slane %v1023_v5, %v1304_v45  ;;  %v867_v13 = vadd.f32 %v865_v52, %v1670_v50 }
 0x1a5   :  { %v1037_v49 = vadd.f32 %v1033_v24, %v1011_v25  ;;  %v885_v39 = vmul.f32 %v876_v28, %v1589_v14  ;;  %v1030_v21 = vmul.f32 %v1028_v20, %v1611_v40  ;;  %v847_v14 = vsub.f32 %v1585_v10, %v838_v15 }
 0x1a6   :  { %v879_v47 = vpop.permute.xlu1 %878  ;;  %v1049_v53 = vpop.permute.xlu0 %1048  ;;  %v864_v10 = vrot.slane %v1687_v41, %v1304_v45 }
 0x1a7   :  { %v889_v11 = vrot.slane %v885_v39, 1  ;;  %v1054_v44 = vrot.slane %v1049_v53, %v1304_v45  ;;  %v1034_v51 = vrot.slane %v1030_v21, 1  ;;  %v983_v50 = vmul.f32 %v974_v2, %v847_v14 }
 0x1a8   :  { %v884_v8 = vrot.slane %v879_v47, %v1304_v45  ;;  %v866_v42 = vmul.f32 %v864_v10, %v1708_v16 }
 0x1a9   :  { %v893_v48 = vadd.f32 %v889_v11, %v867_v13  ;;  %v1056_v35 = vmul.f32 %v1054_v44, %v848_v63  ;;  %v1038_v6 = vadd.f32 %v1034_v51, %v1012_v43  ;;  %v987_v62 = vrot.slane %v983_v50, 2 }
 0x1aa   :  { %v886_v55 = vmul.f32 %v884_v8, %v1611_v40  ;;  %v868_v41 = vadd.f32 %v866_v42, %v1701_v36 }
 0x1ab   :  { %v1060_v46 = vrot.slane %v1056_v35, 2  ;;  %v977_v31 = vpop.permute.xlu1 %976  ;;  %v991_v34 = vadd.f32 %v987_v62, %v1680_v56 }
 0x1ac   :  { %v982_v0 = vrot.slane %v977_v31, %v1304_v45  ;;  %v890_v59 = vrot.slane %v886_v55, 1 }
 0x1ad   :  { %v1064_v57 = vadd.f32 %v1060_v46, %v1038_v6  ;;  %v1067_v3 = vrot.slane %v991_v34, 7 }
 0x1ae   :  { %v984_v60 = vmul.f32 %v982_v0, %v848_v63  ;;  %v894_v19 = vadd.f32 %v890_v59, %v868_v41 }
 0x1af   :  { %v1074_v17 = vrot.slane %v1064_v57, 6 }
 0x1b0   :  { %v988_v32 = vrot.slane %v984_v60, 2  ;;  %v1041_v29 = vpop.permute.xlu1 %1040 }
 0x1b1   :  { %v1046_v27 = vrot.slane %v1041_v29, %v1304_v45 }
 0x1b2   :  { %v992_v18 = vadd.f32 %v988_v32, %v1718_v23 }
 0x1b3   :  { %v1055_v38 = vmul.f32 %v1046_v27, %v847_v14 }
 0x1b4   :  { %v1068_v56 = vrot.slane %v992_v18, 7 }
 0x1b5   :  { %v1059_v33 = vrot.slane %v1055_v38, 2  ;;  %v897_v37 = vpop.permute.xlu1 %896 }
 0x1b6   :  { %v902_v30 = vrot.slane %v897_v37, %v1304_v45 }
 0x1b7   :  { %v1063_v58 = vadd.f32 %v1059_v33, %v1037_v49 }
 0x1b8   :  { %v911_v54 = vmul.f32 %v902_v30, %v847_v14 }
 0x1b9   :  { %v905_v12 = vpop.permute.xlu1 %904  ;;  %v1073_v7 = vrot.slane %v1063_v58, 6 }
 0x1ba   :  { %v915_v23 = vrot.slane %v911_v54, 2  ;;  %v910_v1 = vrot.slane %v905_v12, %v1304_v45 }
 0x1bc   :  { %v919_v26 = vadd.f32 %v915_v23, %v893_v48  ;;  %v912_v40 = vmul.f32 %v910_v1, %v848_v63 }
 0x1be   :  { %v1078_v9 = vsel %vm1077_vm3, %v919_v26, %v1067_v3  ;;  %v916_v16 = vrot.slane %v912_v40, 2 }
 0x1bf   :  { %v1081_v15 = vsel %vm1080_vm4, %v1078_v9, %v1073_v7 }
 0x1c0   :  { %1083 = vst [vmem:[%s1796_s13] sm:$0x7] %v1081_v15  ;;  %v920_v61 = vadd.f32 %v916_v16, %v894_v19 }
 0x1c2   :  { %v1079_v45 = vsel %vm1077_vm3, %v920_v61, %v1068_v56 }
 0x1c3   :  { %v1082_v22 = vsel %vm1080_vm4, %v1079_v45, %v1074_v17 }
 0x1c4   :  { %1084 = vst [vmem:[%s1796_s13 + $0x4] sm:$0x7] %v1082_v22 }
 0x1c5   :  { %1105 = vsyncpa [#allocation3], 1 }

</bundles_post_ra>
